<compile_context>
chip_gen: v7x
topology: tpu7x:2x2x1
jax: 0.10.0
libtpu: 0.0.40
codegen_flags: <defaults>
</compile_context>

<pallas_src>
import functools
import math

import jax
import jax.numpy as jnp
from jax.experimental import pallas as pl
from jax.experimental.pallas import tpu as pltpu


# ----------------------------------------------------------------------------
# Pallas kernel: CrossAttention forward for one block of BM batch rows
# ----------------------------------------------------------------------------
def _cross_attention_kernel(
    # per-block inputs
    cls_ref,       # (BM, E)        f32   cls tokens
    img_ref,       # (BM, S_i, E)   bf16  image features
    # resident parameters
    hm_ref,        # (E, H)  bf16  one-hot head-selector
    hmt_ref,       # (H, E)  bf16  its transpose
    lnq_w, lnq_b,  # (1, E)  f32
    lnk_w, lnk_b,  # (1, E)  f32
    wq, bq,        # (E, E) bf16, (1, E)  f32
    wkv, bkv,      # (E, 2E) bf16, (1, 2E) f32   fused k/v projection
    wo, bo,        # (E, E) bf16, (1, E)  f32
    lnff_w, lnff_b,  # (1, E) f32
    w1, b1,        # (E, 4E) bf16, (1, 4E) f32
    w2, b2,        # (4E, E) bf16, (1, E)  f32
    # output
    out_ref,       # (BM, E) f32
    *,
    scale,
    num_heads,
):
    eps = 1e-5
    f32 = jnp.float32
    bf16 = jnp.bfloat16
    BM, E = cls_ref.shape
    S_i = img_ref.shape[1]
    H = num_heads

    def layer_norm(x, w, b):
        # one-pass mean / variance (E[x^2] - mu^2), f32, clamped at 0 to guard
        # against cancellation.
        mu = jnp.mean(x, axis=-1, keepdims=True)
        msq = jnp.mean(x * x, axis=-1, keepdims=True)
        var = jnp.maximum(msq - mu * mu, 0.0)
        return (x - mu) * jax.lax.rsqrt(var + eps) * w + b

    cls = cls_ref[...]                                   # (BM, E) f32
    x = img_ref[...].astype(f32)                         # (BM, S_i, E) f32

    # LayerNorms on query (cls tokens) and key (image features)
    q = layer_norm(cls, lnq_w[...], lnq_b[...])          # (BM, E)
    k = layer_norm(x, lnk_w[...], lnk_b[...]).astype(bf16).reshape(BM * S_i, E)

    # in-projections on the MXU in bf16 with f32 accumulation (value == key);
    # the fused wkv streams the big (BM*S_i, E) LHS through the MXU once.
    qp = jnp.dot(q.astype(bf16), wq[...], preferred_element_type=f32) + bq[...]
    kv = jnp.dot(k, wkv[...], preferred_element_type=f32) + bkv[...]   # (BM*S_i, 2E)
    # lane slices at multiples of 128 (E is a multiple of 128) -> tile-aligned
    kp = kv[:, :E].reshape(BM, S_i, E)
    vp = kv[:, E:].reshape(BM, S_i, E)

    # multi-head attention with query length 1:
    #   scores[b, s, h] = sum_d (scale * qp[b, h*D+d]) * kp[b, s, h*D+d]
    # via elementwise product + bf16 one-hot head-selector matmul (avoids
    # per-head (1 x D) matmuls); scale is folded into the small q side.
    qp = qp * scale
    prod = (kp * qp[:, None, :]).astype(bf16)            # (BM, S_i, E)
    scores = jnp.dot(prod.reshape(BM * S_i, E), hm_ref[...],
                     preferred_element_type=f32).reshape(BM, S_i, H)

    # softmax over the key axis (exact per-head max; exp/sum in f32)
    m = jnp.max(scores, axis=1, keepdims=True)
    ex = jnp.exp(scores - m)
    denom = jnp.sum(ex, axis=1, keepdims=True)
    p = ex * pl.reciprocal(denom, approx=True)           # (BM, S_i, H)

    # attn[b, e] = sum_s p[b, s, head(e)] * vp[b, s, e]
    # (probability expansion runs in bf16; the one-hot selector is exact)
    p_full = jnp.dot(p.reshape(BM * S_i, H).astype(bf16), hmt_ref[...],
                     preferred_element_type=f32).reshape(BM, S_i, E)
    attn = jnp.sum(p_full * vp, axis=1)                  # (BM, E)

    # output projection
    attn = jnp.dot(attn.astype(bf16), wo[...], preferred_element_type=f32) + bo[...]

    # residual + feed-forward (dropout = identity in eval mode)
    fused = cls + attn
    h = layer_norm(fused, lnff_w[...], lnff_b[...])
    h1 = jnp.dot(h.astype(bf16), w1[...], preferred_element_type=f32) + b1[...]
    # exact (erf-based) GELU, matching torch.nn.GELU() default
    h1 = 0.5 * h1 * (1.0 + jax.lax.erf(h1 * (1.0 / math.sqrt(2.0))))
    h2 = jnp.dot(h1.astype(bf16), w2[...], preferred_element_type=f32) + b2[...]

    out_ref[...] = fused + h2


# ----------------------------------------------------------------------------
# Wrapper: batch blocking, parameter packing, BlockSpecs, pallas_call
# ----------------------------------------------------------------------------
def cross_attention_pallas(text_features, image_features, params):
    B, _, E = text_features.shape
    _, S_i, _ = image_features.shape
    H = params["num_heads"]
    D = E // H
    scale = 1.0 / math.sqrt(D)
    f32, bf16 = jnp.float32, jnp.bfloat16

    # glue: extract cls token (query length is always 1) and cast the image
    # features to bf16 (this is ~95% of per-step HBM bytes -> halves the DMA).
    cls = text_features[:, 0, :].astype(f32)             # (B, E)
    img = image_features.astype(bf16)                    # (B, S_i, E)

    # head-selector matrix: hm[e, h] = 1 if e // D == h (heads are contiguous
    # slices of E, matching PyTorch's reshape); exact in bf16.
    head_ids = jnp.arange(E, dtype=jnp.int32) // D
    hm = (head_ids[:, None] == jnp.arange(H, dtype=jnp.int32)[None, :]).astype(bf16)
    hmt = hm.T

    p = params

    def row(v):  # (N,) -> (1, N), f32
        return v.reshape(1, -1).astype(f32)

    param_arrays = [
        hm, hmt,
        row(p["lnq_w"]), row(p["lnq_b"]),
        row(p["lnk_w"]), row(p["lnk_b"]),
        p["wq"].T.astype(bf16), row(p["bq"]),
        jnp.concatenate([p["wk"].T, p["wv"].T], axis=1).astype(bf16),   # (E, 2E)
        jnp.concatenate([p["bk"], p["bv"]]).reshape(1, -1).astype(f32),
        p["wo"].T.astype(bf16), row(p["bo"]),
        row(p["lnff_w"]), row(p["lnff_b"]),
        p["w1"].T.astype(bf16), row(p["b1"]),
        p["w2"].T.astype(bf16), row(p["b2"]),
    ]
    param_bytes = sum(int(a.size) * a.dtype.itemsize for a in param_arrays)

    # --- generation-aware VMEM budget and analytic batch-block size BM ------
    try:
        vmem_cap = int(pltpu.get_tpu_info().vmem_capacity_bytes)
    except Exception:
        vmem_cap = 64 << 20       # conservative fallback (v7x per-core VMEM)

    bytes_per_row = (
        S_i * E * (2 * 2   # image block, bf16, double-buffered by the pipeline
                   + 4     # f32 copy for LayerNorm statistics
                   + 2     # normalised keys (bf16)
                   + 8     # fused K/V projection output (f32, 2E wide)
                   + 2     # q*k product (bf16)
                   + 4)    # expanded attention probabilities (f32)
        + S_i * H * 16     # scores / exp / probs (f32)
        + E * 64           # (row, E)-sized temporaries (qp, attn, h1, ...)
    )
    vmem_budget = int(0.80 * vmem_cap) - 2 * param_bytes - (4 << 20)
    bm_cap = max(8, min(256, vmem_budget // max(bytes_per_row, 1)))

    if B <= bm_cap:
        # single block: no batch padding, full-dim tiles, and no wasted grid
        # steps on single-TensorCore chips (v5e/v6e).
        BM = B
    else:
        BM = max(8, (bm_cap // 8) * 8)
    grid = (pl.cdiv(B, BM),)

    vmem_limit = int(min(int(0.9 * vmem_cap),
                         2 * param_bytes + BM * bytes_per_row + (24 << 20)))
    vmem_limit = max(vmem_limit, 16 << 20)

    # advisory cost estimate so XLA can overlap surrounding ops with the call
    macs_per_row = (E * E                 # q projection
                    + S_i * E * 2 * E     # fused k/v projection
                    + S_i * E * H         # per-head score reduction
                    + S_i * H * E         # probability expansion
                    + E * E               # output projection
                    + 8 * E * E)          # feed-forward (E*4E + 4E*E)
    cost = pl.CostEstimate(
        flops=int(2 * B * macs_per_row),
        transcendentals=int(B * (S_i * H + 4 * E)),
        bytes_accessed=int(img.size * img.dtype.itemsize
                           + 2 * cls.size * 4 + param_bytes),
    )

    def const_spec(arr):  # all parameters are 2-D, resident across the grid
        return pl.BlockSpec(arr.shape, lambda i: (0, 0))

    in_specs = [
        pl.BlockSpec((BM, E), lambda i: (i, 0)),           # cls block
        pl.BlockSpec((BM, S_i, E), lambda i: (i, 0, 0)),   # image block (bf16)
    ] + [const_spec(a) for a in param_arrays]
    out_spec = pl.BlockSpec((BM, E), lambda i: (i, 0))

    kernel = functools.partial(_cross_attention_kernel, scale=scale, num_heads=H)

    out = pl.pallas_call(
        kernel,
        out_shape=jax.ShapeDtypeStruct((B, E), f32),
        grid_spec=pltpu.PrefetchScalarGridSpec(
            num_scalar_prefetch=0,
            grid=grid,
            in_specs=in_specs,
            out_specs=out_spec,
        ),
        compiler_params=pltpu.CompilerParams(
            dimension_semantics=("parallel",),
            vmem_limit_bytes=vmem_limit,
        ),
        cost_estimate=cost,
    )(cls, img, *param_arrays)

    return out


# ----------------------------------------------------------------------------
# Pure-JAX reference (mirrors the PyTorch module in eval mode, full f32)
# ----------------------------------------------------------------------------
def cross_attention_ref(text_features, image_features, params):
    B, S_t, E = text_features.shape
    _, S_i, _ = image_features.shape
    H = params["num_heads"]
    D = E // H
    p = params
    eps = 1e-5

    def ln(x, w, b):
        mu = jnp.mean(x, axis=-1, keepdims=True)
        var = jnp.mean((x - mu) ** 2, axis=-1, keepdims=True)
        return (x - mu) / jnp.sqrt(var + eps) * w + b

    cls = text_features[:, 0:1, :]                                  # (B, 1, E)
    q = ln(cls, p["lnq_w"], p["lnq_b"])
    k = ln(image_features, p["lnk_w"], p["lnk_b"])

    qp = q @ p["wq"].T + p["bq"]                                    # (B, 1, E)
    kp = k @ p["wk"].T + p["bk"]                                    # (B, S_i, E)
    vp = k @ p["wv"].T + p["bv"]                                    # (B, S_i, E)

    qh = qp.reshape(B, 1, H, D).transpose(0, 2, 1, 3)               # (B, H, 1, D)
    kh = kp.reshape(B, S_i, H, D).transpose(0, 2, 1, 3)             # (B, H, S_i, D)
    vh = vp.reshape(B, S_i, H, D).transpose(0, 2, 1, 3)

    scores = jnp.einsum("bhqd,bhkd->bhqk", qh, kh) / math.sqrt(D)
    probs = jax.nn.softmax(scores, axis=-1)
    attn = jnp.einsum("bhqk,bhkd->bhqd", probs, vh)                 # (B, H, 1, D)
    attn = attn.transpose(0, 2, 1, 3).reshape(B, 1, E)
    attn = attn @ p["wo"].T + p["bo"]

    fused = cls + attn
    h = ln(fused, p["lnff_w"], p["lnff_b"])
    h1 = h @ p["w1"].T + p["b1"]
    h1 = 0.5 * h1 * (1.0 + jax.lax.erf(h1 / jnp.sqrt(2.0)))
    h2 = h1 @ p["w2"].T + p["b2"]
    fused = fused + h2
    return fused.squeeze(1)                                         # (B, E)


# ----------------------------------------------------------------------------
# Deterministic parameter initialization (synthetic, not a checkpoint load)
# ----------------------------------------------------------------------------
def init_params(key, embed_dim, num_heads):
    E, F = embed_dim, 4 * embed_dim
    ks = jax.random.split(key, 18)
    n = lambda k, shape, s=0.02: (s * jax.random.normal(k, shape)).astype(jnp.float32)
    return {
        "num_heads": num_heads,
        "lnq_w": 1.0 + n(ks[0], (E,), 0.1), "lnq_b": n(ks[1], (E,), 0.1),
        "lnk_w": 1.0 + n(ks[2], (E,), 0.1), "lnk_b": n(ks[3], (E,), 0.1),
        "wq": n(ks[4], (E, E)), "bq": n(ks[5], (E,)),
        "wk": n(ks[6], (E, E)), "bk": n(ks[7], (E,)),
        "wv": n(ks[8], (E, E)), "bv": n(ks[9], (E,)),
        "wo": n(ks[10], (E, E)), "bo": n(ks[11], (E,)),
        "lnff_w": 1.0 + n(ks[12], (E,), 0.1), "lnff_b": n(ks[13], (E,), 0.1),
        "w1": n(ks[14], (F, E)), "b1": n(ks[15], (F,)),
        "w2": n(ks[16], (E, F)), "b2": n(ks[17], (E,)),
    }


if __name__ == "__main__":
    # Small shapes consistent with the module (embed_dim is a constructor arg).
    B, S_TEXT, S_IMG = 2, 8, 16
    EMBED_DIM, NUM_HEADS = 128, 8

    key = jax.random.PRNGKey(0)
    k_txt, k_img, k_par = jax.random.split(key, 3)

    text_features = jax.random.normal(k_txt, (B, S_TEXT, EMBED_DIM), dtype=jnp.float32)
    image_features = jax.random.normal(k_img, (B, S_IMG, EMBED_DIM), dtype=jnp.float32)
    params = init_params(k_par, EMBED_DIM, NUM_HEADS)

    out = cross_attention_pallas(text_features, image_features, params)
    out = jax.block_until_ready(out)

    ref = cross_attention_ref(text_features, image_features, params)
    ref = jax.block_until_ready(ref)

    assert out.shape == (B, EMBED_DIM), out.shape
    # tolerance covers bf16 image/activation/weight casts and the approximate
    # (EUP) softmax reciprocal; measured max error at these shapes is ~1e-2.
    max_err = float(jnp.max(jnp.abs(out - ref)))
    assert max_err < 4e-2, f"max abs error {max_err}"

    print("KERNEL_OK")
</pallas_src>

<mosaic_0001>
module attributes {stable_mosaic.version = 11 : i64} {
  func.func @_cross_attention_kernel(%arg0: i32, %arg1: memref<2x128xf32, #tpu.memory_space<vmem>>, %arg2: memref<2x16x128xbf16, #tpu.memory_space<vmem>>, %arg3: memref<128x8xbf16, #tpu.memory_space<vmem>>, %arg4: memref<8x128xbf16, #tpu.memory_space<vmem>>, %arg5: memref<1x128xf32, #tpu.memory_space<vmem>>, %arg6: memref<1x128xf32, #tpu.memory_space<vmem>>, %arg7: memref<1x128xf32, #tpu.memory_space<vmem>>, %arg8: memref<1x128xf32, #tpu.memory_space<vmem>>, %arg9: memref<128x128xbf16, #tpu.memory_space<vmem>>, %arg10: memref<1x128xf32, #tpu.memory_space<vmem>>, %arg11: memref<128x256xbf16, #tpu.memory_space<vmem>>, %arg12: memref<1x256xf32, #tpu.memory_space<vmem>>, %arg13: memref<128x128xbf16, #tpu.memory_space<vmem>>, %arg14: memref<1x128xf32, #tpu.memory_space<vmem>>, %arg15: memref<1x128xf32, #tpu.memory_space<vmem>>, %arg16: memref<1x128xf32, #tpu.memory_space<vmem>>, %arg17: memref<128x512xbf16, #tpu.memory_space<vmem>>, %arg18: memref<1x512xf32, #tpu.memory_space<vmem>>, %arg19: memref<512x128xbf16, #tpu.memory_space<vmem>>, %arg20: memref<1x128xf32, #tpu.memory_space<vmem>>, %arg21: memref<2x128xf32, #tpu.memory_space<vmem>>) attributes {dimension_semantics = [#tpu.dimension_semantics<parallel>], iteration_bounds = array<i64: 1>, scalar_prefetch = 0 : i64, scratch_operands = 0 : i64, tpu.core_type = #tpu.core_type<tc>, window_params = [{transform_indices = @transform_0, window_bounds = array<i64: 2, 128>}, {transform_indices = @transform_1, window_bounds = array<i64: 2, 16, 128>}, {pipeline_mode = #tpu.pipeline_mode<synchronous>, transform_indices = @transform_2, window_bounds = array<i64: 128, 8>}, {pipeline_mode = #tpu.pipeline_mode<synchronous>, transform_indices = @transform_3, window_bounds = array<i64: 8, 128>}, {pipeline_mode = #tpu.pipeline_mode<synchronous>, transform_indices = @transform_4, window_bounds = array<i64: 1, 128>}, {pipeline_mode = #tpu.pipeline_mode<synchronous>, transform_indices = @transform_5, window_bounds = array<i64: 1, 128>}, {pipeline_mode = #tpu.pipeline_mode<synchronous>, transform_indices = @transform_6, window_bounds = array<i64: 1, 128>}, {pipeline_mode = #tpu.pipeline_mode<synchronous>, transform_indices = @transform_7, window_bounds = array<i64: 1, 128>}, {pipeline_mode = #tpu.pipeline_mode<synchronous>, transform_indices = @transform_8, window_bounds = array<i64: 128, 128>}, {pipeline_mode = #tpu.pipeline_mode<synchronous>, transform_indices = @transform_9, window_bounds = array<i64: 1, 128>}, {pipeline_mode = #tpu.pipeline_mode<synchronous>, transform_indices = @transform_10, window_bounds = array<i64: 128, 256>}, {pipeline_mode = #tpu.pipeline_mode<synchronous>, transform_indices = @transform_11, window_bounds = array<i64: 1, 256>}, {pipeline_mode = #tpu.pipeline_mode<synchronous>, transform_indices = @transform_12, window_bounds = array<i64: 128, 128>}, {pipeline_mode = #tpu.pipeline_mode<synchronous>, transform_indices = @transform_13, window_bounds = array<i64: 1, 128>}, {pipeline_mode = #tpu.pipeline_mode<synchronous>, transform_indices = @transform_14, window_bounds = array<i64: 1, 128>}, {pipeline_mode = #tpu.pipeline_mode<synchronous>, transform_indices = @transform_15, window_bounds = array<i64: 1, 128>}, {pipeline_mode = #tpu.pipeline_mode<synchronous>, transform_indices = @transform_16, window_bounds = array<i64: 128, 512>}, {pipeline_mode = #tpu.pipeline_mode<synchronous>, transform_indices = @transform_17, window_bounds = array<i64: 1, 512>}, {pipeline_mode = #tpu.pipeline_mode<synchronous>, transform_indices = @transform_18, window_bounds = array<i64: 512, 128>}, {pipeline_mode = #tpu.pipeline_mode<synchronous>, transform_indices = @transform_19, window_bounds = array<i64: 1, 128>}, {transform_indices = @transform_20, window_bounds = array<i64: 2, 128>}]} {
    %c0 = arith.constant 0 : index
    %c0_0 = arith.constant 0 : index
    %0 = vector.load %arg1[%c0, %c0_0] : memref<2x128xf32, #tpu.memory_space<vmem>>, vector<2x128xf32>
    %c0_1 = arith.constant 0 : index
    %c0_2 = arith.constant 0 : index
    %c0_3 = arith.constant 0 : index
    %1 = vector.load %arg2[%c0_1, %c0_2, %c0_3] : memref<2x16x128xbf16, #tpu.memory_space<vmem>>, vector<2x16x128xbf16>
    %2 = arith.extf %1 : vector<2x16x128xbf16> to vector<2x16x128xf32>
    %c0_4 = arith.constant 0 : index
    %c0_5 = arith.constant 0 : index
    %3 = vector.load %arg5[%c0_4, %c0_5] : memref<1x128xf32, #tpu.memory_space<vmem>>, vector<1x128xf32>
    %c0_6 = arith.constant 0 : index
    %c0_7 = arith.constant 0 : index
    %4 = vector.load %arg6[%c0_6, %c0_7] : memref<1x128xf32, #tpu.memory_space<vmem>>, vector<1x128xf32>
    %cst = arith.constant dense<0.000000e+00> : vector<2xf32>
    %5 = vector.multi_reduction <add>, %0, %cst [1] : vector<2x128xf32> to vector<2xf32>
    %6 = vector.shape_cast %5 : vector<2xf32> to vector<2x1xf32>
    %cst_8 = arith.constant 1.280000e+02 : f32
    %7 = vector.broadcast %cst_8 : f32 to vector<2x1xf32>
    %8 = arith.divf %6, %7 : vector<2x1xf32>
    %9 = arith.mulf %0, %0 : vector<2x128xf32>
    %cst_9 = arith.constant dense<0.000000e+00> : vector<2xf32>
    %10 = vector.multi_reduction <add>, %9, %cst_9 [1] : vector<2x128xf32> to vector<2xf32>
    %11 = vector.shape_cast %10 : vector<2xf32> to vector<2x1xf32>
    %cst_10 = arith.constant 1.280000e+02 : f32
    %12 = vector.broadcast %cst_10 : f32 to vector<2x1xf32>
    %13 = arith.divf %11, %12 : vector<2x1xf32>
    %14 = arith.mulf %8, %8 : vector<2x1xf32>
    %15 = arith.subf %13, %14 : vector<2x1xf32>
    %cst_11 = arith.constant 0.000000e+00 : f32
    %16 = vector.broadcast %cst_11 : f32 to vector<2x1xf32>
    %17 = arith.maximumf %15, %16 : vector<2x1xf32>
    %18 = vector.broadcast %8 : vector<2x1xf32> to vector<2x128xf32>
    %19 = arith.subf %0, %18 : vector<2x128xf32>
    %cst_12 = arith.constant 9.99999974E-6 : f32
    %20 = vector.broadcast %cst_12 : f32 to vector<2x1xf32>
    %21 = arith.addf %17, %20 : vector<2x1xf32>
    %22 = math.rsqrt %21 : vector<2x1xf32>
    %23 = vector.broadcast %22 : vector<2x1xf32> to vector<2x128xf32>
    %24 = arith.mulf %19, %23 : vector<2x128xf32>
    %25 = vector.broadcast %3 : vector<1x128xf32> to vector<2x128xf32>
    %26 = arith.mulf %24, %25 : vector<2x128xf32>
    %27 = vector.broadcast %4 : vector<1x128xf32> to vector<2x128xf32>
    %28 = arith.addf %26, %27 : vector<2x128xf32>
    %c0_13 = arith.constant 0 : index
    %c0_14 = arith.constant 0 : index
    %29 = vector.load %arg7[%c0_13, %c0_14] : memref<1x128xf32, #tpu.memory_space<vmem>>, vector<1x128xf32>
    %c0_15 = arith.constant 0 : index
    %c0_16 = arith.constant 0 : index
    %30 = vector.load %arg8[%c0_15, %c0_16] : memref<1x128xf32, #tpu.memory_space<vmem>>, vector<1x128xf32>
    %cst_17 = arith.constant dense<0.000000e+00> : vector<2x16xf32>
    %31 = vector.multi_reduction <add>, %2, %cst_17 [2] : vector<2x16x128xf32> to vector<2x16xf32>
    %32 = vector.shape_cast %31 : vector<2x16xf32> to vector<2x16x1xf32>
    %cst_18 = arith.constant 1.280000e+02 : f32
    %33 = vector.broadcast %cst_18 : f32 to vector<2x16x1xf32>
    %34 = arith.divf %32, %33 : vector<2x16x1xf32>
    %35 = arith.mulf %2, %2 : vector<2x16x128xf32>
    %cst_19 = arith.constant dense<0.000000e+00> : vector<2x16xf32>
    %36 = vector.multi_reduction <add>, %35, %cst_19 [2] : vector<2x16x128xf32> to vector<2x16xf32>
    %37 = vector.shape_cast %36 : vector<2x16xf32> to vector<2x16x1xf32>
    %cst_20 = arith.constant 1.280000e+02 : f32
    %38 = vector.broadcast %cst_20 : f32 to vector<2x16x1xf32>
    %39 = arith.divf %37, %38 : vector<2x16x1xf32>
    %40 = arith.mulf %34, %34 : vector<2x16x1xf32>
    %41 = arith.subf %39, %40 : vector<2x16x1xf32>
    %cst_21 = arith.constant 0.000000e+00 : f32
    %42 = vector.broadcast %cst_21 : f32 to vector<2x16x1xf32>
    %43 = arith.maximumf %41, %42 : vector<2x16x1xf32>
    %44 = vector.broadcast %34 : vector<2x16x1xf32> to vector<2x16x128xf32>
    %45 = arith.subf %2, %44 : vector<2x16x128xf32>
    %cst_22 = arith.constant 9.99999974E-6 : f32
    %46 = vector.broadcast %cst_22 : f32 to vector<2x16x1xf32>
    %47 = arith.addf %43, %46 : vector<2x16x1xf32>
    %48 = math.rsqrt %47 : vector<2x16x1xf32>
    %49 = vector.broadcast %48 : vector<2x16x1xf32> to vector<2x16x128xf32>
    %50 = arith.mulf %45, %49 : vector<2x16x128xf32>
    %51 = vector.shape_cast %29 : vector<1x128xf32> to vector<1x1x128xf32>
    %52 = vector.broadcast %51 : vector<1x1x128xf32> to vector<2x16x128xf32>
    %53 = arith.mulf %50, %52 : vector<2x16x128xf32>
    %54 = vector.shape_cast %30 : vector<1x128xf32> to vector<1x1x128xf32>
    %55 = vector.broadcast %54 : vector<1x1x128xf32> to vector<2x16x128xf32>
    %56 = arith.addf %53, %55 : vector<2x16x128xf32>
    %57 = arith.truncf %56 : vector<2x16x128xf32> to vector<2x16x128xbf16>
    %58 = vector.shape_cast %57 : vector<2x16x128xbf16> to vector<32x128xbf16>
    %59 = arith.truncf %28 : vector<2x128xf32> to vector<2x128xbf16>
    %c0_23 = arith.constant 0 : index
    %c0_24 = arith.constant 0 : index
    %60 = vector.load %arg9[%c0_23, %c0_24] : memref<128x128xbf16, #tpu.memory_space<vmem>>, vector<128x128xbf16>
    %cst_25 = arith.constant dense<0.000000e+00> : vector<2x128xf32>
    %61 = tpu.matmul %59, %60, %cst_25 {dimension_numbers = #tpu.dot_dimension_numbers<[1], [0], [0], [1], [0, 0, 1, 1], [], []>} : vector<2x128xbf16>, vector<128x128xbf16>, vector<2x128xf32> -> vector<2x128xf32>
    %c0_26 = arith.constant 0 : index
    %c0_27 = arith.constant 0 : index
    %62 = vector.load %arg10[%c0_26, %c0_27] : memref<1x128xf32, #tpu.memory_space<vmem>>, vector<1x128xf32>
    %63 = vector.broadcast %62 : vector<1x128xf32> to vector<2x128xf32>
    %64 = arith.addf %61, %63 : vector<2x128xf32>
    %c0_28 = arith.constant 0 : index
    %c0_29 = arith.constant 0 : index
    %65 = vector.load %arg11[%c0_28, %c0_29] : memref<128x256xbf16, #tpu.memory_space<vmem>>, vector<128x256xbf16>
    %cst_30 = arith.constant dense<0.000000e+00> : vector<32x256xf32>
    %66 = tpu.matmul %58, %65, %cst_30 {dimension_numbers = #tpu.dot_dimension_numbers<[1], [0], [0], [1], [0, 0, 1, 1], [], []>} : vector<32x128xbf16>, vector<128x256xbf16>, vector<32x256xf32> -> vector<32x256xf32>
    %c0_31 = arith.constant 0 : index
    %c0_32 = arith.constant 0 : index
    %67 = vector.load %arg12[%c0_31, %c0_32] : memref<1x256xf32, #tpu.memory_space<vmem>>, vector<1x256xf32>
    %68 = vector.broadcast %67 : vector<1x256xf32> to vector<32x256xf32>
    %69 = arith.addf %66, %68 : vector<32x256xf32>
    %70 = vector.extract_strided_slice %69 {offsets = [0, 0], sizes = [32, 128], strides = [1, 1]} : vector<32x256xf32> to vector<32x128xf32>
    %71 = vector.shape_cast %70 : vector<32x128xf32> to vector<2x16x128xf32>
    %72 = vector.extract_strided_slice %69 {offsets = [0, 128], sizes = [32, 128], strides = [1, 1]} : vector<32x256xf32> to vector<32x128xf32>
    %73 = vector.shape_cast %72 : vector<32x128xf32> to vector<2x16x128xf32>
    %cst_33 = arith.constant 2.500000e-01 : f32
    %74 = vector.broadcast %cst_33 : f32 to vector<2x128xf32>
    %75 = arith.mulf %64, %74 : vector<2x128xf32>
    %76 = vector.shape_cast %75 : vector<2x128xf32> to vector<2x1x128xf32>
    %77 = vector.broadcast %76 : vector<2x1x128xf32> to vector<2x16x128xf32>
    %78 = arith.mulf %71, %77 : vector<2x16x128xf32>
    %79 = arith.truncf %78 : vector<2x16x128xf32> to vector<2x16x128xbf16>
    %80 = vector.shape_cast %79 : vector<2x16x128xbf16> to vector<32x128xbf16>
    %c0_34 = arith.constant 0 : index
    %c0_35 = arith.constant 0 : index
    %81 = vector.load %arg3[%c0_34, %c0_35] : memref<128x8xbf16, #tpu.memory_space<vmem>>, vector<128x8xbf16>
    %cst_36 = arith.constant dense<0.000000e+00> : vector<32x8xf32>
    %82 = tpu.matmul %80, %81, %cst_36 {dimension_numbers = #tpu.dot_dimension_numbers<[1], [0], [0], [1], [0, 0, 1, 1], [], []>} : vector<32x128xbf16>, vector<128x8xbf16>, vector<32x8xf32> -> vector<32x8xf32>
    %83 = vector.shape_cast %82 : vector<32x8xf32> to vector<2x16x8xf32>
    %cst_37 = arith.constant dense<0xFF800000> : vector<2x8xf32>
    %84 = vector.multi_reduction <maximumf>, %83, %cst_37 [1] : vector<2x16x8xf32> to vector<2x8xf32>
    %85 = vector.shape_cast %84 : vector<2x8xf32> to vector<2x1x8xf32>
    %86 = vector.broadcast %85 : vector<2x1x8xf32> to vector<2x16x8xf32>
    %87 = arith.subf %83, %86 : vector<2x16x8xf32>
    %88 = math.exp %87 : vector<2x16x8xf32>
    %cst_38 = arith.constant dense<0.000000e+00> : vector<2x8xf32>
    %89 = vector.multi_reduction <add>, %88, %cst_38 [1] : vector<2x16x8xf32> to vector<2x8xf32>
    %90 = vector.shape_cast %89 : vector<2x8xf32> to vector<2x1x8xf32>
    %91 = tpu.reciprocal %90 {approx = true} : vector<2x1x8xf32> -> vector<2x1x8xf32>
    %92 = vector.broadcast %91 : vector<2x1x8xf32> to vector<2x16x8xf32>
    %93 = arith.mulf %88, %92 : vector<2x16x8xf32>
    %94 = vector.shape_cast %93 : vector<2x16x8xf32> to vector<32x8xf32>
    %95 = arith.truncf %94 : vector<32x8xf32> to vector<32x8xbf16>
    %c0_39 = arith.constant 0 : index
    %c0_40 = arith.constant 0 : index
    %96 = vector.load %arg4[%c0_39, %c0_40] : memref<8x128xbf16, #tpu.memory_space<vmem>>, vector<8x128xbf16>
    %cst_41 = arith.constant dense<0.000000e+00> : vector<32x128xf32>
    %97 = tpu.matmul %95, %96, %cst_41 {dimension_numbers = #tpu.dot_dimension_numbers<[1], [0], [0], [1], [0, 0, 1, 1], [], []>} : vector<32x8xbf16>, vector<8x128xbf16>, vector<32x128xf32> -> vector<32x128xf32>
    %98 = vector.shape_cast %97 : vector<32x128xf32> to vector<2x16x128xf32>
    %99 = arith.mulf %98, %73 : vector<2x16x128xf32>
    %cst_42 = arith.constant dense<0.000000e+00> : vector<2x128xf32>
    %100 = vector.multi_reduction <add>, %99, %cst_42 [1] : vector<2x16x128xf32> to vector<2x128xf32>
    %101 = arith.truncf %100 : vector<2x128xf32> to vector<2x128xbf16>
    %c0_43 = arith.constant 0 : index
    %c0_44 = arith.constant 0 : index
    %102 = vector.load %arg13[%c0_43, %c0_44] : memref<128x128xbf16, #tpu.memory_space<vmem>>, vector<128x128xbf16>
    %cst_45 = arith.constant dense<0.000000e+00> : vector<2x128xf32>
    %103 = tpu.matmul %101, %102, %cst_45 {dimension_numbers = #tpu.dot_dimension_numbers<[1], [0], [0], [1], [0, 0, 1, 1], [], []>} : vector<2x128xbf16>, vector<128x128xbf16>, vector<2x128xf32> -> vector<2x128xf32>
    %c0_46 = arith.constant 0 : index
    %c0_47 = arith.constant 0 : index
    %104 = vector.load %arg14[%c0_46, %c0_47] : memref<1x128xf32, #tpu.memory_space<vmem>>, vector<1x128xf32>
    %105 = vector.broadcast %104 : vector<1x128xf32> to vector<2x128xf32>
    %106 = arith.addf %103, %105 : vector<2x128xf32>
    %107 = arith.addf %0, %106 : vector<2x128xf32>
    %c0_48 = arith.constant 0 : index
    %c0_49 = arith.constant 0 : index
    %108 = vector.load %arg15[%c0_48, %c0_49] : memref<1x128xf32, #tpu.memory_space<vmem>>, vector<1x128xf32>
    %c0_50 = arith.constant 0 : index
    %c0_51 = arith.constant 0 : index
    %109 = vector.load %arg16[%c0_50, %c0_51] : memref<1x128xf32, #tpu.memory_space<vmem>>, vector<1x128xf32>
    %cst_52 = arith.constant dense<0.000000e+00> : vector<2xf32>
    %110 = vector.multi_reduction <add>, %107, %cst_52 [1] : vector<2x128xf32> to vector<2xf32>
    %111 = vector.shape_cast %110 : vector<2xf32> to vector<2x1xf32>
    %cst_53 = arith.constant 1.280000e+02 : f32
    %112 = vector.broadcast %cst_53 : f32 to vector<2x1xf32>
    %113 = arith.divf %111, %112 : vector<2x1xf32>
    %114 = arith.mulf %107, %107 : vector<2x128xf32>
    %cst_54 = arith.constant dense<0.000000e+00> : vector<2xf32>
    %115 = vector.multi_reduction <add>, %114, %cst_54 [1] : vector<2x128xf32> to vector<2xf32>
    %116 = vector.shape_cast %115 : vector<2xf32> to vector<2x1xf32>
    %cst_55 = arith.constant 1.280000e+02 : f32
    %117 = vector.broadcast %cst_55 : f32 to vector<2x1xf32>
    %118 = arith.divf %116, %117 : vector<2x1xf32>
    %119 = arith.mulf %113, %113 : vector<2x1xf32>
    %120 = arith.subf %118, %119 : vector<2x1xf32>
    %cst_56 = arith.constant 0.000000e+00 : f32
    %121 = vector.broadcast %cst_56 : f32 to vector<2x1xf32>
    %122 = arith.maximumf %120, %121 : vector<2x1xf32>
    %123 = vector.broadcast %113 : vector<2x1xf32> to vector<2x128xf32>
    %124 = arith.subf %107, %123 : vector<2x128xf32>
    %cst_57 = arith.constant 9.99999974E-6 : f32
    %125 = vector.broadcast %cst_57 : f32 to vector<2x1xf32>
    %126 = arith.addf %122, %125 : vector<2x1xf32>
    %127 = math.rsqrt %126 : vector<2x1xf32>
    %128 = vector.broadcast %127 : vector<2x1xf32> to vector<2x128xf32>
    %129 = arith.mulf %124, %128 : vector<2x128xf32>
    %130 = vector.broadcast %108 : vector<1x128xf32> to vector<2x128xf32>
    %131 = arith.mulf %129, %130 : vector<2x128xf32>
    %132 = vector.broadcast %109 : vector<1x128xf32> to vector<2x128xf32>
    %133 = arith.addf %131, %132 : vector<2x128xf32>
    %134 = arith.truncf %133 : vector<2x128xf32> to vector<2x128xbf16>
    %c0_58 = arith.constant 0 : index
    %c0_59 = arith.constant 0 : index
    %135 = vector.load %arg17[%c0_58, %c0_59] : memref<128x512xbf16, #tpu.memory_space<vmem>>, vector<128x512xbf16>
    %cst_60 = arith.constant dense<0.000000e+00> : vector<2x512xf32>
    %136 = tpu.matmul %134, %135, %cst_60 {dimension_numbers = #tpu.dot_dimension_numbers<[1], [0], [0], [1], [0, 0, 1, 1], [], []>} : vector<2x128xbf16>, vector<128x512xbf16>, vector<2x512xf32> -> vector<2x512xf32>
    %c0_61 = arith.constant 0 : index
    %c0_62 = arith.constant 0 : index
    %137 = vector.load %arg18[%c0_61, %c0_62] : memref<1x512xf32, #tpu.memory_space<vmem>>, vector<1x512xf32>
    %138 = vector.broadcast %137 : vector<1x512xf32> to vector<2x512xf32>
    %139 = arith.addf %136, %138 : vector<2x512xf32>
    %cst_63 = arith.constant 5.000000e-01 : f32
    %140 = vector.broadcast %cst_63 : f32 to vector<2x512xf32>
    %141 = arith.mulf %140, %139 : vector<2x512xf32>
    %cst_64 = arith.constant 0.707106769 : f32
    %142 = vector.broadcast %cst_64 : f32 to vector<2x512xf32>
    %143 = arith.mulf %139, %142 : vector<2x512xf32>
    %144 = math.erf %143 : vector<2x512xf32>
    %cst_65 = arith.constant 1.000000e+00 : f32
    %145 = vector.broadcast %cst_65 : f32 to vector<2x512xf32>
    %146 = arith.addf %145, %144 : vector<2x512xf32>
    %147 = arith.mulf %141, %146 : vector<2x512xf32>
    %148 = arith.truncf %147 : vector<2x512xf32> to vector<2x512xbf16>
    %c0_66 = arith.constant 0 : index
    %c0_67 = arith.constant 0 : index
    %149 = vector.load %arg19[%c0_66, %c0_67] : memref<512x128xbf16, #tpu.memory_space<vmem>>, vector<512x128xbf16>
    %cst_68 = arith.constant dense<0.000000e+00> : vector<2x128xf32>
    %150 = tpu.matmul %148, %149, %cst_68 {dimension_numbers = #tpu.dot_dimension_numbers<[1], [0], [0], [1], [0, 0, 1, 1], [], []>} : vector<2x512xbf16>, vector<512x128xbf16>, vector<2x128xf32> -> vector<2x128xf32>
    %c0_69 = arith.constant 0 : index
    %c0_70 = arith.constant 0 : index
    %151 = vector.load %arg20[%c0_69, %c0_70] : memref<1x128xf32, #tpu.memory_space<vmem>>, vector<1x128xf32>
    %152 = vector.broadcast %151 : vector<1x128xf32> to vector<2x128xf32>
    %153 = arith.addf %150, %152 : vector<2x128xf32>
    %154 = arith.addf %107, %153 : vector<2x128xf32>
    %c0_71 = arith.constant 0 : index
    %c0_72 = arith.constant 0 : index
    %155 = vector.load %arg21[%c0_71, %c0_72] : memref<2x128xf32, #tpu.memory_space<vmem>>, vector<2x128xf32>
    tpu.vector_store %arg21[%c0_71, %c0_72], %154 {strides = array<i32>} : memref<2x128xf32, #tpu.memory_space<vmem>>, vector<2x128xf32>,
    return
  }
  func.func @transform_0(%arg0: i32) -> (i32, i32) {
    %c0_i32 = arith.constant 0 : i32
    %c0_i32_0 = arith.constant 0 : i32
    return %arg0, %c0_i32 : i32, i32
  }
  func.func @transform_1(%arg0: i32) -> (i32, i32, i32) {
    %c0_i32 = arith.constant 0 : i32
    %c0_i32_0 = arith.constant 0 : i32
    %c0_i32_1 = arith.constant 0 : i32
    return %arg0, %c0_i32, %c0_i32_0 : i32, i32, i32
  }
  func.func @transform_2(%arg0: i32) -> (i32, i32) {
    %c0_i32 = arith.constant 0 : i32
    %c0_i32_0 = arith.constant 0 : i32
    %c0_i32_1 = arith.constant 0 : i32
    return %c0_i32, %c0_i32_0 : i32, i32
  }
  func.func @transform_3(%arg0: i32) -> (i32, i32) {
    %c0_i32 = arith.constant 0 : i32
    %c0_i32_0 = arith.constant 0 : i32
    %c0_i32_1 = arith.constant 0 : i32
    return %c0_i32, %c0_i32_0 : i32, i32
  }
  func.func @transform_4(%arg0: i32) -> (i32, i32) {
    %c0_i32 = arith.constant 0 : i32
    %c0_i32_0 = arith.constant 0 : i32
    %c0_i32_1 = arith.constant 0 : i32
    return %c0_i32, %c0_i32_0 : i32, i32
  }
  func.func @transform_5(%arg0: i32) -> (i32, i32) {
    %c0_i32 = arith.constant 0 : i32
    %c0_i32_0 = arith.constant 0 : i32
    %c0_i32_1 = arith.constant 0 : i32
    return %c0_i32, %c0_i32_0 : i32, i32
  }
  func.func @transform_6(%arg0: i32) -> (i32, i32) {
    %c0_i32 = arith.constant 0 : i32
    %c0_i32_0 = arith.constant 0 : i32
    %c0_i32_1 = arith.constant 0 : i32
    return %c0_i32, %c0_i32_0 : i32, i32
  }
  func.func @transform_7(%arg0: i32) -> (i32, i32) {
    %c0_i32 = arith.constant 0 : i32
    %c0_i32_0 = arith.constant 0 : i32
    %c0_i32_1 = arith.constant 0 : i32
    return %c0_i32, %c0_i32_0 : i32, i32
  }
  func.func @transform_8(%arg0: i32) -> (i32, i32) {
    %c0_i32 = arith.constant 0 : i32
    %c0_i32_0 = arith.constant 0 : i32
    %c0_i32_1 = arith.constant 0 : i32
    return %c0_i32, %c0_i32_0 : i32, i32
  }
  func.func @transform_9(%arg0: i32) -> (i32, i32) {
    %c0_i32 = arith.constant 0 : i32
    %c0_i32_0 = arith.constant 0 : i32
    %c0_i32_1 = arith.constant 0 : i32
    return %c0_i32, %c0_i32_0 : i32, i32
  }
  func.func @transform_10(%arg0: i32) -> (i32, i32) {
    %c0_i32 = arith.constant 0 : i32
    %c0_i32_0 = arith.constant 0 : i32
    %c0_i32_1 = arith.constant 0 : i32
    return %c0_i32, %c0_i32_0 : i32, i32
  }
  func.func @transform_11(%arg0: i32) -> (i32, i32) {
    %c0_i32 = arith.constant 0 : i32
    %c0_i32_0 = arith.constant 0 : i32
    %c0_i32_1 = arith.constant 0 : i32
    return %c0_i32, %c0_i32_0 : i32, i32
  }
  func.func @transform_12(%arg0: i32) -> (i32, i32) {
    %c0_i32 = arith.constant 0 : i32
    %c0_i32_0 = arith.constant 0 : i32
    %c0_i32_1 = arith.constant 0 : i32
    return %c0_i32, %c0_i32_0 : i32, i32
  }
  func.func @transform_13(%arg0: i32) -> (i32, i32) {
    %c0_i32 = arith.constant 0 : i32
    %c0_i32_0 = arith.constant 0 : i32
    %c0_i32_1 = arith.constant 0 : i32
    return %c0_i32, %c0_i32_0 : i32, i32
  }
  func.func @transform_14(%arg0: i32) -> (i32, i32) {
    %c0_i32 = arith.constant 0 : i32
    %c0_i32_0 = arith.constant 0 : i32
    %c0_i32_1 = arith.constant 0 : i32
    return %c0_i32, %c0_i32_0 : i32, i32
  }
  func.func @transform_15(%arg0: i32) -> (i32, i32) {
    %c0_i32 = arith.constant 0 : i32
    %c0_i32_0 = arith.constant 0 : i32
    %c0_i32_1 = arith.constant 0 : i32
    return %c0_i32, %c0_i32_0 : i32, i32
  }
  func.func @transform_16(%arg0: i32) -> (i32, i32) {
    %c0_i32 = arith.constant 0 : i32
    %c0_i32_0 = arith.constant 0 : i32
    %c0_i32_1 = arith.constant 0 : i32
    return %c0_i32, %c0_i32_0 : i32, i32
  }
  func.func @transform_17(%arg0: i32) -> (i32, i32) {
    %c0_i32 = arith.constant 0 : i32
    %c0_i32_0 = arith.constant 0 : i32
    %c0_i32_1 = arith.constant 0 : i32
    return %c0_i32, %c0_i32_0 : i32, i32
  }
  func.func @transform_18(%arg0: i32) -> (i32, i32) {
    %c0_i32 = arith.constant 0 : i32
    %c0_i32_0 = arith.constant 0 : i32
    %c0_i32_1 = arith.constant 0 : i32
    return %c0_i32, %c0_i32_0 : i32, i32
  }
  func.func @transform_19(%arg0: i32) -> (i32, i32) {
    %c0_i32 = arith.constant 0 : i32
    %c0_i32_0 = arith.constant 0 : i32
    %c0_i32_1 = arith.constant 0 : i32
    return %c0_i32, %c0_i32_0 : i32, i32
  }
  func.func @transform_20(%arg0: i32) -> (i32, i32) {
    %c0_i32 = arith.constant 0 : i32
    %c0_i32_0 = arith.constant 0 : i32
    return %arg0, %c0_i32 : i32, i32
  }
}

</mosaic_0001>

<bundles_post_ra>
// kernel: tpu_custom_call.1
= control target key start
LH: loop header
LB: loop body
LE: loop exit
PB: predicated region body
PF: predicated region fallthrough
CT: control target
= control target key end

     0   :  { %s2593_s0 = inlined_call_operand.vmem [shape: f32[2,128], index: 0, kind: input, shape index: {}]   ;;  %s2594_s1 = inlined_call_operand.vmem [shape: bf16[2,16,128], index: 1, kind: input, shape index: {}]   ;;  %s2595_s2 = inlined_call_operand.vmem [shape: bf16[128,8], index: 2, kind: input, shape index: {}]   ;;  %s2596_s3 = inlined_call_operand.vmem [shape: bf16[8,128], index: 3, kind: input, shape index: {}]   ;;  %s2597_s4 = inlined_call_operand.vmem [shape: f32[1,128], index: 4, kind: input, shape index: {}]   ;;  %s2598_s5 = inlined_call_operand.vmem [shape: f32[1,128], index: 5, kind: input, shape index: {}]   ;;  %s2599_s6 = inlined_call_operand.vmem [shape: f32[1,128], index: 6, kind: input, shape index: {}]   ;;  %s2600_s7 = inlined_call_operand.vmem [shape: f32[1,128], index: 7, kind: input, shape index: {}]   ;;  %s2601_s8 = inlined_call_operand.vmem [shape: bf16[128,128], index: 8, kind: input, shape index: {}]   ;;  %s2602_s9 = inlined_call_operand.vmem [shape: f32[1,128], index: 9, kind: input, shape index: {}]   ;;  %s2603_s10 = inlined_call_operand.hbm [shape: bf16[128,256], index: 10, kind: input, shape index: {}]   ;;  %s2604_s11 = inlined_call_operand.vmem [shape: f32[1,256], index: 11, kind: input, shape index: {}]   ;;  %s2605_s12 = inlined_call_operand.hbm [shape: bf16[128,128], index: 12, kind: input, shape index: {}]   ;;  %s2606_s13 = inlined_call_operand.vmem [shape: f32[1,128], index: 13, kind: input, shape index: {}]   ;;  %s2607_s14 = inlined_call_operand.vmem [shape: f32[1,128], index: 14, kind: input, shape index: {}]   ;;  %s2608_s15 = inlined_call_operand.vmem [shape: f32[1,128], index: 15, kind: input, shape index: {}]   ;;  %s2609_s16 = inlined_call_operand.hbm [shape: bf16[128,512], index: 16, kind: input, shape index: {}]   ;;  %s2610_s17 = inlined_call_operand.vmem [shape: f32[1,512], index: 17, kind: input, shape index: {}]   ;;  %s2611_s18 = inlined_call_operand.hbm [shape: bf16[512,128], index: 18, kind: input, shape index: {}]   ;;  %s2612_s19 = inlined_call_operand.vmem [shape: f32[1,128], index: 19, kind: input, shape index: {}]   ;;  %s2613_s20 = inlined_call_operand.hbm [shape: f32[2,128], index: 20, kind: output, shape index: {}]  }
   0x1   :  { %2618 = sst [smem:[#allocation15_spill]] %s2593_s0 }
   0x2   :  { %2619 = sst [smem:[#allocation16_spill]] %s2594_s1 }
   0x3   :  { %2620 = sst [smem:[#allocation17_spill]] %s2595_s2 }
   0x4   :  { %2621 = sst [smem:[#allocation18_spill]] %s2596_s3 }
   0x5   :  { %2622 = sst [smem:[#allocation19_spill]] %s2597_s4 }
   0x6   :  { %25 = vsyncpa [#allocation3], 0 }
   0x7   :  { %26 = vsyncpa [#allocation6], 0 }
   0x8   :  { %27 = vsyncpa [#allocation9], 0 }
   0x9   :  { %28 = vsyncpa [#allocation4], 0  ;;  %s2203_s1 = smov [#allocation5]   ;;  %s2085_s2 = scalar_lea.hbm %s2605_s12, 1024 }
   0xa   :  { %s68_s22 = sshll.u32 %s2203_s1, 4  ;;  %p2086_p0 = scmp.ne.s32.totalorder %s2605_s12, %s2085_s2  ;;  %s69_s22 = int_to_ptr.vmem [resolvable:$true] %s68_s22 }
   0xb   :  { %p2089_p1 = scmp.lt.u32.totalorder %s2085_s2, %s2605_s12 }
   0xd   :  { %p2091_p2 = pnand %p2089_p1, %p2086_p0 }
   0xf   :  { %2094 = shalt.err (!%p2091_p2)
}
  0x10   :  { %s2095_s28 = scalar_lea.vmem %s69_s22, 1024  ;;  %p2100_p4 = scmp.lt.s32.totalorder %s69_s22, %s69_s22 }
  0x11   :  { %p2096_p3 = scmp.ne.s32.totalorder %s69_s22, %s2095_s28  ;;  %p2101_p5 = scmp.lt.s32.totalorder %s2095_s28, %s2095_s28 }
  0x13   :  { %p2102_p6 = por %p2101_p5, %p2100_p4 }
  0x15   :  { %p2103_p7 = pnand %p2102_p6, %p2096_p3 }
  0x17   :  { %2106 = shalt.err (!%p2103_p7)
}
  0x18   :  { %s2617_s4 = smov 64   ;;  %s2205_s29 = smov 4  }
  0x19   :  { %74 = dma.hbm_to_vmem [thread:$0]  %s2605_s12, 1024, %s69_s22, [#allocation6], %s2617_s4, %s2617_s4, %s2205_s29  }
  0x1a   :  { %s2206_s21 = smov [#allocation2]   ;;  %s2107_s2 = scalar_lea.hbm %s2603_s10, 2048 }
  0x1b   :  { %s54_s1 = sshll.u32 %s2206_s21, 4  ;;  %p2108_p8 = scmp.ne.s32.totalorder %s2603_s10, %s2107_s2  ;;  %s55_s1 = int_to_ptr.vmem [resolvable:$true] %s54_s1 }
  0x1c   :  { %p2111_p9 = scmp.lt.u32.totalorder %s2107_s2, %s2603_s10 }
  0x1e   :  { %p2113_p10 = pnand %p2111_p9, %p2108_p8 }
  0x20   :  { %2116 = shalt.err (!%p2113_p10)
}
  0x21   :  { %s2117_s28 = scalar_lea.vmem %s55_s1, 2048  ;;  %p2122_p12 = scmp.lt.s32.totalorder %s55_s1, %s55_s1 }
  0x22   :  { %p2118_p11 = scmp.ne.s32.totalorder %s55_s1, %s2117_s28  ;;  %p2123_p13 = scmp.lt.s32.totalorder %s2117_s28, %s2117_s28 }
  0x24   :  { %p2124_p0 = por %p2123_p13, %p2122_p12 }
  0x26   :  { %p2125_p1 = pnand %p2124_p0, %p2118_p11 }
  0x28   :  { %2128 = shalt.err (!%p2125_p1)
}
  0x29   :  { %s2207_s12 = smov 128   ;;  %s2208_s22 = smov 8  }
  0x2a   :  { %60 = dma.hbm_to_vmem [thread:$0]  %s2603_s10, 2048, %s55_s1, [#allocation3], %s2207_s12, %s2207_s12, %s2208_s22  }
  0x2b   :  { %s2209_s21 = smov [#allocation7]   ;;  %s2129_s25 = scalar_lea.hbm %s2609_s16, 4096 }
  0x2c   :  { %s86_s23 = sshll.u32 %s2209_s21, 4  ;;  %p2130_p2 = scmp.ne.s32.totalorder %s2609_s16, %s2129_s25  ;;  %s87_s23 = int_to_ptr.vmem [resolvable:$true] %s86_s23 }
  0x2d   :  { %p2133_p3 = scmp.lt.u32.totalorder %s2129_s25, %s2609_s16 }
  0x2f   :  { %p2135_p4 = pnand %p2133_p3, %p2130_p2 }
  0x31   :  { %2138 = shalt.err (!%p2135_p4)
}
  0x32   :  { %s2139_s4 = scalar_lea.vmem %s87_s23, 4096  ;;  %p2144_p6 = scmp.lt.s32.totalorder %s87_s23, %s87_s23 }
  0x33   :  { %p2140_p5 = scmp.ne.s32.totalorder %s87_s23, %s2139_s4  ;;  %p2145_p7 = scmp.lt.s32.totalorder %s2139_s4, %s2139_s4 }
  0x35   :  { %p2146_p8 = por %p2145_p7, %p2144_p6 }
  0x37   :  { %p2147_p9 = pnand %p2146_p8, %p2140_p5 }
  0x39   :  { %2150 = shalt.err (!%p2147_p9)
}
  0x3a   :  { %s2210_s10 = smov 256   ;;  %s2211_s1 = smov 16  }
  0x3b   :  { %92 = dma.hbm_to_vmem [thread:$0]  %s2609_s16, 4096, %s87_s23, [#allocation6], %s2210_s10, %s2210_s10, %s2211_s1  }
  0x3c   :  { %s2212_s30 = smov [#allocation8]   ;;  %s2151_s2 = scalar_lea.hbm %s2611_s18, 4096 }
  0x3d   :  { %s100_s0 = sshll.u32 %s2212_s30, 4  ;;  %p2152_p10 = scmp.ne.s32.totalorder %s2611_s18, %s2151_s2  ;;  %s101_s0 = int_to_ptr.vmem [resolvable:$true] %s100_s0 }
  0x3e   :  { %p2155_p11 = scmp.lt.u32.totalorder %s2151_s2, %s2611_s18 }
  0x40   :  { %p2157_p12 = pnand %p2155_p11, %p2152_p10 }
  0x42   :  { %2160 = shalt.err (!%p2157_p12)
}
  0x43   :  { %s2161_s27 = scalar_lea.vmem %s101_s0, 4096  ;;  %p2166_p0 = scmp.lt.s32.totalorder %s101_s0, %s101_s0 }
  0x44   :  { %p2162_p13 = scmp.ne.s32.totalorder %s101_s0, %s2161_s27  ;;  %p2167_p1 = scmp.lt.s32.totalorder %s2161_s27, %s2161_s27 }
  0x46   :  { %p2168_p2 = por %p2167_p1, %p2166_p0 }
  0x48   :  { %p2169_p3 = pnand %p2168_p2, %p2162_p13 }
  0x4a   :  { %2172 = shalt.err (!%p2169_p3)
}
  0x4b   :  { %s2623_s16 = smov 64  }
  0x4c   :  { %106 = dma.hbm_to_vmem [thread:$0]  %s2611_s18, 4096, %s101_s0, [#allocation9], %s2623_s16, %s2623_s16, %s2205_s29  }
  0x4d   :  { %2195 = dma.done.wait [#allocation3], 2048  }
  0x4e   :  { %2196 = vsyncadd [#allocation3], 4294965248 }
  0x4f   :  { %2197 = dma.done.wait [#allocation6], 5120  }
  0x50   :  { %2198 = vsyncadd [#allocation6], 4294962176 }
  0x51   :  { %2199 = dma.done.wait [#allocation9], 4096  }
  0x52   :  { %2200 = vsyncadd [#allocation9], 4294963200  ;;  %vm133_vm0 = vcmask 1041408   ;;  %s2624_s12 = sld [smem:[#allocation15_spill]]  ;;  %s2625_s21 = sld [smem:[#allocation16_spill]]  ;;  %v1924_v14 = vld [vmem:[%s2601_s8] sm:$0xff]  }
  0x53   :  { %v2213_v15 = vmov 0.0   ;;  %v1925_v16 = vld [vmem:[#allocation2 + $0x4] ss:$8 sps:$4 sm:$0xff]   ;;  %v1928_v18 = vld [vmem:[#allocation2] ss:$8 sps:$4 sm:$0xff]   ;;  %v1931_v20 = vld [vmem:[%s2601_s8 + $0x10] sm:$0xff]  }
  0x54   :  { %1842 = vmatprep.subr.bf16.mxu0 %v2213_v15  ;;  %v1927_v17 = vld [vmem:[%s2601_s8 + $0x8] sm:$0xff]   ;;  %465 = vmatprep.subr.bf16.mxu1 %v1925_v16  ;;  %v1929_v19 = vld [vmem:[#allocation2 + $0x14] ss:$8 sps:$4 sm:$0xff]   ;;  %v1932_v21 = vld [vmem:[#allocation2 + $0x10] ss:$8 sps:$4 sm:$0xff]   ;;  %vm2214_vm1 = vmmov 0  }
  0x55   :  { %1843 = vmatpush3.bf16.msra.mxu0 %v1924_v14  ;;  %466 = vmatpush1.bf16.msra.mxu1 %v1928_v18  ;;  %v1933_v22 = vld [vmem:[#allocation2 + $0x24] ss:$8 sps:$4 sm:$0xff]   ;;  %v1935_v23 = vld [vmem:[%s2601_s8 + $0x18] sm:$0xff]   ;;  %v1936_v24 = vld [vmem:[#allocation2 + $0x20] ss:$8 sps:$4 sm:$0xff]   ;;  %v2215_v39 = vmov 0  }
  0x56   :  { %1844 = vmatprep.subr.bf16.mxu0 %v2213_v15  ;;  %467 = vmatprep.subr.bf16.mxu1 %v1929_v19  ;;  %v1937_v25 = vld [vmem:[#allocation2 + $0x34] ss:$8 sps:$4 sm:$0xff]   ;;  %v1939_v26 = vld [vmem:[%s2601_s8 + $0x20] sm:$0xff]   ;;  %v1940_v27 = vld [vmem:[#allocation2 + $0x30] ss:$8 sps:$4 sm:$0xff]   ;;  %s2626_s29 = sld [smem:[#allocation17_spill]] }
  0x57   :  { %v1941_v28 = vld [vmem:[#allocation2 + $0x44] ss:$8 sps:$4 sm:$0xff]   ;;  %v1944_v30 = vld [vmem:[#allocation2 + $0x40] ss:$8 sps:$4 sm:$0xff]   ;;  %v1945_v31 = vld [vmem:[#allocation2 + $0x54] ss:$8 sps:$4 sm:$0xff]   ;;  %1858 = vmatprep.mubr.msk.bf16.mxu0 %vm2214_vm1, %v2213_v15  ;;  %497 = vmatprep.mubr.bf16.mxu1 %v2215_v39 }
  0x58   :  { %v2380_v0 = vld [vmem:[%s2624_s12] sm:$0x3]  ;;  %v1766_v7 = vld [vmem:[%s2625_s21 + $0x8] sm:$0xff]   ;;  %v1947_v32 = vld [vmem:[%s2601_s8 + $0x30] sm:$0xff]   ;;  %s2627_s2 = sld [smem:[#allocation19_spill]]  ;;  %vm735_vm2 = vcmask 1043456  }
  0x59   :  { %v1759_v1 = vld [vmem:[%s2625_s21] sm:$0xff]   ;;  %v134_v2 = vsel %vm133_vm0, %v2380_v0, 0.0  ;;  %v139_v4 = vmul.f32 %v2380_v0, %v2380_v0  ;;  %v2403_v10 = vunpack.c.l.bf16 %v1766_v7  ;;  %v2405_v11 = vunpack.c.h.bf16 %v1766_v7  ;;  %1845 = vmatpush3.bf16.msra.mxu0 %v1927_v17  ;;  %468 = vmatpush1.bf16.msra.mxu1 %v1932_v21  ;;  %v1943_v29 = vld [vmem:[%s2601_s8 + $0x28] sm:$0xff]   ;;  %v1948_v33 = vld [vmem:[#allocation2 + $0x50] ss:$8 sps:$4 sm:$0xff]   ;;  %s2217_s28 = smov [#allocation10]  }
  0x5a   :  { %v2387_v3 = vunpack.c.h.bf16 %v1759_v1  ;;  %135 = vadd.xlane.f32.xlu0 %v134_v2  ;;  %v2391_v5 = vunpack.c.l.bf16 %v1759_v1  ;;  %1846 = vmatprep.subr.bf16.mxu0 %v2213_v15  ;;  %v1949_v34 = vld [vmem:[#allocation2 + $0x64] ss:$8 sps:$4 sm:$0xff]   ;;  %v1951_v35 = vld [vmem:[%s2601_s8 + $0x38] sm:$0xff]   ;;  %v1952_v36 = vld [vmem:[#allocation2 + $0x60] ss:$8 sps:$4 sm:$0xff]   ;;  %vm671_vm3 = vcmask 64512  }
  0x5b   :  { %v140_v6 = vsel %vm133_vm0, %v139_v4, 0.0  ;;  %v181_v12 = vmul.f32 %v2403_v10, %v2403_v10  ;;  %v182_v13 = vmul.f32 %v2405_v11, %v2405_v11  ;;  %469 = vmatprep.subr.bf16.mxu1 %v1933_v22  ;;  %v1953_v37 = vld [vmem:[#allocation2 + $0x74] ss:$8 sps:$4 sm:$0xff]   ;;  %v1955_v38 = vld [vmem:[#allocation2 + $0x70] ss:$8 sps:$4 sm:$0xff]   ;;  %vm835_vm4 = vcmask 1041409  }
  0x5c   :  { %169 = vadd.xlane.f32.xlu1 %v2387_v3  ;;  %v179_v8 = vmul.f32 %v2391_v5, %v2391_v5  ;;  %v180_v9 = vmul.f32 %v2387_v3, %v2387_v3  ;;  %v2452_v40 = vld [vmem:[%s2626_s29] sm:$0xff]   ;;  %s1632_s10 = sshll.u32 %s2217_s28, 4  ;;  %s1633_s10 = int_to_ptr.vmem [resolvable:$true] %s1632_s10 }
  0x5d   :  { %1847 = vmatpush3.bf16.msra.mxu0 %v1931_v20  ;;  %470 = vmatpush1.bf16.msra.mxu1 %v1936_v24  ;;  %s2173_s1 = scalar_lea.vmem %s1633_s10, 32  ;;  %p2178_p5 = scmp.lt.s32.totalorder %s1633_s10, %s1633_s10 }
  0x5e   :  { %167 = vadd.xlane.f32.xlu0 %v2391_v5  ;;  %1848 = vmatprep.subr.bf16.mxu0 %v2213_v15  ;;  %p2174_p4 = scmp.ne.s32.totalorder %s1633_s10, %s2173_s1  ;;  %p2179_p6 = scmp.lt.s32.totalorder %s2173_s1, %s2173_s1 }
  0x5f   :  { %471 = vmatprep.subr.bf16.mxu1 %v1937_v25  ;;  %v1643_v25 = vld [vmem:[%s2627_s2] ss:$0 sm:$0xff] }
  0x60   :  { %141 = vadd.xlane.f32.xlu1 %v140_v6  ;;  %p2180_p7 = por %p2179_p6, %p2178_p5 }
  0x61   :  { %1849 = vmatpush3.bf16.msra.mxu0 %v1935_v23  ;;  %472 = vmatpush1.bf16.msra.mxu1 %v1940_v27 }
  0x62   :  { %183 = vadd.xlane.f32.xlu0 %v179_v8  ;;  %1850 = vmatprep.subr.bf16.mxu0 %v2213_v15  ;;  %p2181_p8 = pnand %p2180_p7, %p2174_p4 }
  0x63   :  { %473 = vmatprep.subr.bf16.mxu1 %v1941_v28  ;;  %v1644_v28 = vld [vmem:[%s2598_s5] ss:$0 sm:$0xff] }
  0x64   :  { %185 = vadd.xlane.f32.xlu1 %v180_v9 }
  0x65   :  { %1851 = vmatpush3.bf16.msra.mxu0 %v1939_v26  ;;  %474 = vmatpush1.bf16.msra.mxu1 %v1944_v30 }
  0x66   :  { %171 = vadd.xlane.f32.xlu0 %v2403_v10  ;;  %1852 = vmatprep.subr.bf16.mxu0 %v2213_v15 }
  0x67   :  { %475 = vmatprep.subr.bf16.mxu1 %v1945_v31  ;;  %v1645_v31 = vld [vmem:[%s2599_s6] ss:$0 sm:$0xff] }
  0x68   :  { %173 = vadd.xlane.f32.xlu1 %v2405_v11 }
  0x69   :  { %1853 = vmatpush3.bf16.msra.mxu0 %v1943_v29  ;;  %476 = vmatpush1.bf16.msra.mxu1 %v1948_v33 }
  0x6a   :  { %187 = vadd.xlane.f32.xlu0 %v181_v12  ;;  %1854 = vmatprep.subr.bf16.mxu0 %v2213_v15 }
  0x6b   :  { %477 = vmatprep.subr.bf16.mxu1 %v1949_v34 }
  0x6c   :  { %189 = vadd.xlane.f32.xlu1 %v182_v13 }
  0x6d   :  { %1855 = vmatpush3.bf16.msra.mxu0 %v1947_v32  ;;  %478 = vmatpush1.bf16.msra.mxu1 %v1952_v36 }
  0x6e   :  { %1856 = vmatprep.subr.bf16.mxu0 %v2213_v15  ;;  %479 = vmatprep.subr.bf16.mxu1 %v1953_v37 }
  0x71   :  { %1857 = vmatpush3.bf16.msra.mxu0 %v1951_v35  ;;  %480 = vmatpush1.bf16.msra.mxu1 %v1955_v38 }
  0x72   :  { %1888 = vmatprep.subr.bf16.mxu1 %v2213_v15  ;;  %1862 = vmatprep.subr.bf16.mxu0 %v2452_v40 }
  0xe7   :  { %v136_v41 = vpop.xlane.xlu0 %135 }
  0xe8   :  { %v138_v43 = vmul.f32 0.0078125, %v136_v41 }
  0xe9   :  { %v170_v42 = vpop.xlane.xlu1 %169 }
  0xea   :  { %v144_v47 = vmul.f32 %v138_v43, %v138_v43  ;;  %v176_v48 = vmul.f32 0.0078125, %v170_v42  ;;  %v147_v21 = vsub.f32 %v2380_v0, %v138_v43 }
  0xeb   :  { %v168_v44 = vpop.xlane.xlu0 %167 }
  0xec   :  { %v175_v45 = vmul.f32 0.0078125, %v168_v44  ;;  %v196_v55 = vmul.f32 %v176_v48, %v176_v48  ;;  %v208_v30 = vsub.f32 %v2387_v3, %v176_v48  ;;  %v1957_v3 = vld [vmem:[%s2626_s29 + $0x8] sm:$0xff]  }
  0xed   :  { %v142_v46 = vpop.xlane.xlu1 %141 }
  0xee   :  { %v143_v49 = vmul.f32 0.0078125, %v142_v46  ;;  %v195_v50 = vmul.f32 %v175_v45, %v175_v45  ;;  %v207_v27 = vsub.f32 %v2391_v5, %v175_v45  ;;  %v1646_v5 = vld [vmem:[%s2600_s7] ss:$0 sm:$0xff] }
  0xef   :  { %v184_v52 = vpop.xlane.xlu0 %183 }
  0xf0   :  { %v145_v51 = vsub.f32 %v143_v49, %v144_v47  ;;  %v191_v53 = vmul.f32 0.0078125, %v184_v52  ;;  %v1958_v47 = vld [vmem:[%s2626_s29 + $0x10] sm:$0xff]  }
  0xf1   :  { %v186_v54 = vpop.xlane.xlu1 %185 }
  0xf2   :  { %v146_v56 = vmax.f32 %v145_v51, 0.0  ;;  %v192_v57 = vmul.f32 0.0078125, %v186_v54  ;;  %v199_v58 = vsub.f32 %v191_v53, %v195_v50  ;;  %v1959_v53 = vld [vmem:[%s2626_s29 + $0x18] sm:$0xff]   ;;  %v1960_v54 = vld [vmem:[%s2626_s29 + $0x20] sm:$0xff]  }
  0xf3   :  { %v172_v61 = vpop.xlane.xlu0 %171 }
  0xf4   :  { %v148_v59 = vadd.f32 1e-05, %v146_v56  ;;  %v200_v60 = vsub.f32 %v192_v57, %v196_v55  ;;  %v203_v62 = vmax.f32 %v199_v58, 0.0  ;;  %v177_v63 = vmul.f32 0.0078125, %v172_v61  ;;  %v1961_v55 = vld [vmem:[%s2626_s29 + $0x28] sm:$0xff]   ;;  %v1962_v56 = vld [vmem:[%s2626_s29 + $0x30] sm:$0xff]  }
  0xf5   :  { %v174_v1 = vpop.xlane.xlu1 %173  ;;  %v1963_v57 = vld [vmem:[%s2626_s29 + $0x38] sm:$0xff]   ;;  %v375_v58 = vlaneseq  ;;  %s2628_s29 = sld [smem:[#allocation18_spill]] }
  0xf6   :  { %2052 = vrsqrt.f32 %v148_v59  ;;  %v204_v2 = vmax.f32 %v200_v60, 0.0  ;;  %v178_v4 = vmul.f32 0.0078125, %v174_v1  ;;  %v211_v6 = vadd.f32 1e-05, %v203_v62 }
  0xf7   :  { %v197_v7 = vmul.f32 %v177_v63, %v177_v63  ;;  %v188_v9 = vpop.xlane.xlu0 %187  ;;  %v209_v43 = vsub.f32 %v2403_v10, %v177_v63  ;;  %v2216_v59 = vmov 1966171168   ;;  %v2497_v61 = vshrl.u32 %v375_v58, 7  ;;  %v1647_v63 = vld [vmem:[%s2602_s9] ss:$0 sm:$0xff] }
  0xf8   :  { %v212_v8 = vadd.f32 1e-05, %v204_v2  ;;  %2054 = vrsqrt.f32 %v211_v6  ;;  %v193_v12 = vmul.f32 0.0078125, %v188_v9  ;;  %v198_v14 = vmul.f32 %v178_v4, %v178_v4  ;;  %v373_v2 = vld [vmem:[%s2604_s11] sm:$0x3] }
  0xf9   :  { %v190_v13 = vpop.xlane.xlu1 %189  ;;  %v210_v45 = vsub.f32 %v2405_v11, %v178_v4  ;;  %v521_v60 = vunpack.c.l.s4 %v2216_v59  ;;  %v381_v1 = vsub.s32 1, %v2497_v61  ;;  %v2508_v9 = vsub.s32 0, %v2497_v61 }
  0xfa   :  { %2056 = vrsqrt.f32 %v212_v8  ;;  %v194_v16 = vmul.f32 0.0078125, %v190_v13  ;;  %v201_v17 = vsub.f32 %v193_v12, %v197_v7 }
  0xfb   :  { %v522_v62 = vunpack.c.0.s8 %v521_v60  ;;  %v382_v13 = vrot.slane %v373_v2, %v381_v1 }
  0xfc   :  { %v202_v18 = vsub.f32 %v194_v16, %v198_v14  ;;  %v205_v19 = vmax.f32 %v201_v17, 0.0 }
  0xfd   :  { %v525_v7 = vsub.s32 %v522_v62, %v2497_v61 }
  0xfe   :  { %v206_v20 = vmax.f32 %v202_v18, 0.0  ;;  %v213_v22 = vadd.f32 1e-05, %v205_v19  ;;  %v378_v19 = vrot.slane %v373_v2, %v2508_v9 }
 0x100   :  { %v2053_v23 = vpop.eup %2052  ;;  %v214_v24 = vadd.f32 1e-05, %v206_v20  ;;  %2058 = vrsqrt.f32 %v213_v22 }
 0x101   :  { %v150_v26 = vmul.f32 %v2053_v23, %v147_v21 }
 0x102   :  { %2060 = vrsqrt.f32 %v214_v24  ;;  %v2055_v29 = vpop.eup %2054 }
 0x103   :  { %v157_v0 = vmul.f32 %v1643_v25, %v150_v26  ;;  %v219_v33 = vmul.f32 %v2055_v29, %v207_v27 }
 0x104   :  { %v2057_v32 = vpop.eup %2056 }
 0x105   :  { %v164_v34 = vadd.f32 %v1644_v28, %v157_v0  ;;  %v220_v35 = vmul.f32 %v2057_v32, %v208_v30  ;;  %v229_v36 = vmul.f32 %v1645_v31, %v219_v33 }
 0x107   :  { %v245_v37 = vpack.c.bf16 %v164_v34, %v164_v34  ;;  %v230_v38 = vmul.f32 %v1645_v31, %v220_v35  ;;  %v239_v41 = vadd.f32 %v1646_v5, %v229_v36 }
 0x109   :  { %1859 = vmatmul.mubr.bf16.vlgmr.msra.gmra.mrb[0].mxu0 %v245_v37  ;;  %v240_v42 = vadd.f32 %v1646_v5, %v230_v38 }
 0x10a   :  { %1863 = vmatpush3.bf16.msra.mxu0 %v2452_v40  ;;  %v2059_v44 = vpop.eup %2058 }
 0x10b   :  { %v243_v46 = vpack.c.bf16 %v240_v42, %v239_v41  ;;  %1864 = vmatprep.subr.bf16.mxu0 %v1957_v3  ;;  %v221_v49 = vmul.f32 %v2059_v44, %v209_v43 }
 0x10c   :  { %v2061_v48 = vpop.eup %2060 }
 0x10d   :  { %498 = vmatmul.mubr.bf16.vlgmr.msra.gmra.mrb[0].mxu1 %v243_v46  ;;  %v222_v50 = vmul.f32 %v2061_v48, %v210_v45  ;;  %v231_v51 = vmul.f32 %v1645_v31, %v221_v49  ;;  %v728_v45 = vld [vmem:[%s2628_s29] sm:$0xf] }
 0x10e   :  { %507 = vmatprep.mubr.bf16.mxu1 %v2215_v39  ;;  %1865 = vmatpush3.bf16.msra.mxu0 %v1957_v3  ;;  %v737_v46 = vsel %vm735_vm2, %v728_v45, 0 }
 0x10f   :  { %v232_v10 = vmul.f32 %v1645_v31, %v222_v50  ;;  %1866 = vmatprep.subr.bf16.mxu0 %v1958_v47  ;;  %v241_v40 = vadd.f32 %v1646_v5, %v231_v51 }
 0x111   :  { %v242_v52 = vadd.f32 %v1646_v5, %v232_v10 }
 0x112   :  { %1867 = vmatpush3.bf16.msra.mxu0 %v1958_v47  ;;  %v1964_v47 = vld [vmem:[#allocation5] sm:$0xff]  }
 0x113   :  { %v244_v11 = vpack.c.bf16 %v242_v52, %v241_v40  ;;  %1868 = vmatprep.subr.bf16.mxu0 %v1959_v53  ;;  %1889 = vmatpush3.bf16.msra.mxu1 %v1964_v47 }
 0x114   :  { %1890 = vmatprep.subr.bf16.mxu1 %v2213_v15 }
 0x115   :  { %508 = vmatmul.mubr.bf16.gmra.mrb[4].mxu1 %v244_v11 }
 0x116   :  { %1904 = vmatprep.mubr.msk.bf16.mxu1 %vm2214_vm1, %v2213_v15  ;;  %1869 = vmatpush3.bf16.msra.mxu0 %v1959_v53 }
 0x117   :  { %1870 = vmatprep.subr.bf16.mxu0 %v1960_v54 }
 0x11a   :  { %1871 = vmatpush3.bf16.msra.mxu0 %v1960_v54 }
 0x11b   :  { %1872 = vmatprep.subr.bf16.mxu0 %v1961_v55 }
 0x11e   :  { %1873 = vmatpush3.bf16.msra.mxu0 %v1961_v55 }
 0x11f   :  { %1874 = vmatprep.subr.bf16.mxu0 %v1962_v56 }
 0x122   :  { %1875 = vmatpush3.bf16.msra.mxu0 %v1962_v56 }
 0x123   :  { %1876 = vmatprep.subr.bf16.mxu0 %v1963_v57 }
 0x126   :  { %1877 = vmatpush3.bf16.msra.mxu0 %v1963_v57 }
 0x127   :  { %1908 = vmatprep.subr.msk.bf16.mxu0 %vm735_vm2, %v728_v45 }
 0x1dc   :  { %v351_v4 = vpop.f32.mrb[0].mxu0 }
 0x1dd   :  { %v352_v6 = vadd.f32 %v1647_v63, %v351_v4  ;;  %v1860_v8 = vpop.f32.mrb[1].mxu0 }
 0x1de   :  { %v354_v12 = vpop.f32.mrb[2].mxu0 }
 0x1df   :  { %v518_v14 = vmul.f32 0.25, %v352_v6  ;;  %v1861_v16 = vpop.f32.mrb[3].mxu0 }
 0x1e0   :  { %v499_v17 = vpop.f32.mrb[0].mxu1 }
 0x1e1   :  { %v526_v18 = vrot.slane %v518_v14, %v525_v7  ;;  %v501_v20 = vpop.f32.mrb[1].mxu1  ;;  %v500_v27 = vadd.f32 %v499_v17, %v378_v19 }
 0x1e2   :  { %v2513_v21 = vadd.f32 %v501_v20, %v382_v13  ;;  %v503_v22 = vpop.f32.mrb[2].mxu1 }
 0x1e3   :  { %v527_v23 = vcombine.high %v526_v18, %v526_v18  ;;  %v534_v24 = vrot.slane %v526_v18, %v525_v7  ;;  %v505_v25 = vpop.f32.mrb[3].mxu1  ;;  %v504_v29 = vadd.f32 %v503_v22, %v378_v19 }
 0x1e4   :  { %v2515_v26 = vadd.f32 %v505_v25, %v382_v13 }
 0x1e5   :  { %v545_v28 = vrot.slane %v534_v24, %v2508_v9  ;;  %v541_v30 = vrot.slane %v527_v23, %v525_v7 }
 0x1e7   :  { %v552_v0 = vmul.f32 %v545_v28, %v500_v27  ;;  %v553_v31 = vmul.f32 %v545_v28, %v504_v29  ;;  %v549_v34 = vrot.slane %v541_v30, %v2508_v9 }
 0x1e8   :  { %v509_v32 = vpop.f32.mrb[4].mxu1 }
 0x1e9   :  { %v510_v33 = vadd.f32 %v509_v32, %v378_v19  ;;  %v511_v5 = vpop.f32.mrb[5].mxu1  ;;  %v556_v35 = vpack.c.bf16 %v553_v31, %v552_v0 }
 0x1ea   :  { %v2519_v36 = vadd.f32 %v511_v5, %v382_v13  ;;  %v513_v37 = vpop.f32.mrb[6].mxu1 }
 0x1eb   :  { %v554_v38 = vmul.f32 %v549_v34, %v510_v33  ;;  %v514_v3 = vadd.f32 %v513_v37, %v378_v19  ;;  %v515_v41 = vpop.f32.mrb[7].mxu1  ;;  %1878 = vmatprep.mubr.bf16.mxu0 %v556_v35 }
 0x1ec   :  { %v2521_v42 = vadd.f32 %v515_v41, %v382_v13 }
 0x1ed   :  { %v555_v43 = vmul.f32 %v549_v34, %v514_v3 }
 0x1ef   :  { %v557_v44 = vpack.c.bf16 %v555_v43, %v554_v38 }
 0x1f1   :  { %1879 = vmatmul.mubr.bf16.vlgmr.msra.gmra.mrb[4].mxu0 %v557_v44 }
 0x1f2   :  { %1883 = vmatpush3.bf16.msra.mxu0 %v737_v46 }
 0x2c4   :  { %v1880_v48 = vpop.f32.mrb[4].mxu0 }
 0x2c5   :  { %v656_v49 = vpop.f32.mrb[5].mxu0  ;;  %v681_v51 = vsel %vm671_vm3, %v1880_v48, -inf }
 0x2c6   :  { %v1881_v50 = vpop.f32.mrb[6].mxu0  ;;  %v672_v52 = vsel %vm671_vm3, %v656_v49, -inf }
 0x2c7   :  { %v682_v10 = vsel %vm671_vm3, %v1881_v50, -inf  ;;  %v659_v40 = vpop.f32.mrb[7].mxu0 }
 0x2c8   :  { %v683_v11 = vmax.f32 %v681_v51, %v682_v10  ;;  %v673_v53 = vsel %vm671_vm3, %v659_v40, -inf }
 0x2c9   :  { %v674_v54 = vmax.f32 %v672_v52, %v673_v53  ;;  %v1966_v52 = vld [vmem:[#allocation5 + $0x10] sm:$0xff]   ;;  %v1968_v53 = vld [vmem:[#allocation5 + $0x20] sm:$0xff]  }
 0x2ca   :  { %v684_v55 = vrot.slane %v683_v11, 4 }
 0x2cb   :  { %v675_v56 = vrot.slane %v674_v54, 4 }
 0x2cc   :  { %v685_v57 = vmax.f32 %v683_v11, %v684_v55  ;;  %v1967_v11 = vld [vmem:[#allocation5 + $0x18] sm:$0xff]   ;;  %v1970_v55 = vld [vmem:[#allocation5 + $0x30] sm:$0xff]  }
 0x2cd   :  { %v676_v58 = vmax.f32 %v674_v54, %v675_v56  ;;  %v1969_v54 = vld [vmem:[#allocation5 + $0x28] sm:$0xff]   ;;  %v1971_v56 = vld [vmem:[#allocation5 + $0x38] sm:$0xff]  }
 0x2ce   :  { %v686_v59 = vrot.slane %v685_v57, 2 }
 0x2cf   :  { %v677_v60 = vrot.slane %v676_v58, 2 }
 0x2d0   :  { %v687_v62 = vmax.f32 %v685_v57, %v686_v59 }
 0x2d1   :  { %v678_v63 = vmax.f32 %v676_v58, %v677_v60 }
 0x2d2   :  { %v688_v2 = vrot.slane %v687_v62, 1 }
 0x2d3   :  { %v679_v4 = vrot.slane %v678_v63, 1 }
 0x2d4   :  { %v689_v6 = vmax.f32 %v687_v62, %v688_v2 }
 0x2d5   :  { %v680_v7 = vmax.f32 %v678_v63, %v679_v4 }
 0x2d6   :  { %v692_v8 = vsub.f32 %v1880_v48, %v689_v6  ;;  %v693_v12 = vsub.f32 %v1881_v50, %v689_v6 }
 0x2d7   :  { %v690_v13 = vsub.f32 %v656_v49, %v680_v7  ;;  %v691_v14 = vsub.f32 %v659_v40, %v680_v7  ;;  %v1965_v40 = vld [vmem:[#allocation5 + $0x8] sm:$0xff]  }
 0x2d8   :  { %v698_v16 = vmul.f32 1.442695, %v692_v8  ;;  %v700_v17 = vmul.f32 1.442695, %v693_v12  ;;  %1891 = vmatpush3.bf16.msra.mxu1 %v1965_v40  ;;  %v1993_v40 = vld [vmem:[#allocation7 + $0x68] ss:$16 sps:$4 sm:$0xff]  }
 0x2d9   :  { %v694_v18 = vmul.f32 1.442695, %v690_v13  ;;  %v696_v19 = vmul.f32 1.442695, %v691_v14  ;;  %1892 = vmatprep.subr.bf16.mxu1 %v2213_v15 }
 0x2da   :  { %2062 = vpow2.f32 %v698_v16 }
 0x2db   :  { %2064 = vpow2.f32 %v700_v17 }
 0x2dc   :  { %2066 = vpow2.f32 %v694_v18  ;;  %1893 = vmatpush3.bf16.msra.mxu1 %v1966_v52  ;;  %v1996_v52 = vld [vmem:[#allocation7 + $0x80] ss:$16 sps:$4 sm:$0xff]  }
 0x2dd   :  { %2068 = vpow2.f32 %v696_v19  ;;  %1894 = vmatprep.subr.bf16.mxu1 %v2213_v15 }
 0x2e0   :  { %1895 = vmatpush3.bf16.msra.mxu1 %v1967_v11  ;;  %v1998_v11 = vld [vmem:[#allocation7 + $0x84] ss:$16 sps:$4 sm:$0xff]  }
 0x2e1   :  { %1896 = vmatprep.subr.bf16.mxu1 %v2213_v15 }
 0x2e4   :  { %v2063_v20 = vpop.eup %2062  ;;  %1897 = vmatpush3.bf16.msra.mxu1 %v1968_v53  ;;  %v1999_v53 = vld [vmem:[#allocation7 + $0x88] ss:$16 sps:$4 sm:$0xff]  }
 0x2e5   :  { %v2065_v22 = vpop.eup %2064  ;;  %v711_v23 = vsel %vm671_vm3, %v2063_v20, 0.0  ;;  %1898 = vmatprep.subr.bf16.mxu1 %v2213_v15 }
 0x2e6   :  { %v2067_v24 = vpop.eup %2066  ;;  %v712_v25 = vsel %vm671_vm3, %v2065_v22, 0.0 }
 0x2e7   :  { %v2069_v27 = vpop.eup %2068  ;;  %v713_v28 = vadd.f32 %v712_v25, %v711_v23  ;;  %v702_v29 = vsel %vm671_vm3, %v2067_v24, 0.0 }
 0x2e8   :  { %v703_v30 = vsel %vm671_vm3, %v2069_v27, 0.0  ;;  %1899 = vmatpush3.bf16.msra.mxu1 %v1969_v54  ;;  %v2001_v54 = vld [vmem:[#allocation7 + $0x8c] ss:$16 sps:$4 sm:$0xff]  }
 0x2e9   :  { %v714_v0 = vrot.slane %v713_v28, 4  ;;  %v704_v31 = vadd.f32 %v703_v30, %v702_v29  ;;  %1900 = vmatprep.subr.bf16.mxu1 %v2213_v15  ;;  %v1975_v29 = vld [vmem:[#allocation7 + $0x8] ss:$16 sps:$4 sm:$0xff]   ;;  %v1977_v30 = vld [vmem:[#allocation7 + $0xc] ss:$16 sps:$4 sm:$0xff]  }
 0x2eb   :  { %v715_v32 = vadd.f32 %v714_v0, %v713_v28  ;;  %v705_v33 = vrot.slane %v704_v31, 4  ;;  %v1974_v28 = vld [vmem:[#allocation7 + $0x4] ss:$16 sps:$4 sm:$0xff]   ;;  %v1682_v0 = vld [vmem:[%s2606_s13] ss:$0 sm:$0xff] }
 0x2ec   :  { %1901 = vmatpush3.bf16.msra.mxu1 %v1970_v55  ;;  %1175 = vmatprep.subr.bf16.mxu0 %v1974_v28  ;;  %v2004_v55 = vld [vmem:[#allocation7 + $0xa4] ss:$16 sps:$4 sm:$0xff]  }
 0x2ed   :  { %v716_v34 = vrot.slane %v715_v32, 2  ;;  %v706_v5 = vadd.f32 %v705_v33, %v704_v31  ;;  %1902 = vmatprep.subr.bf16.mxu1 %v2213_v15 }
 0x2ef   :  { %v717_v35 = vadd.f32 %v716_v34, %v715_v32  ;;  %v707_v37 = vrot.slane %v706_v5, 2 }
 0x2f0   :  { %1903 = vmatpush3.bf16.msra.mxu1 %v1971_v56  ;;  %v2007_v56 = vld [vmem:[#allocation7 + $0xac] ss:$16 sps:$4 sm:$0xff]  }
 0x2f1   :  { %v718_v38 = vrot.slane %v717_v35, 1  ;;  %v708_v3 = vadd.f32 %v707_v37, %v706_v5  ;;  %1216 = vmatprep.subr.bf16.mxu1 %v1977_v30  ;;  %v2025_v30 = vld [vmem:[#allocation8 + $0xc8] sm:$0xff]  }
 0x2f3   :  { %v719_v41 = vadd.f32 %v718_v38, %v717_v35  ;;  %v709_v43 = vrot.slane %v708_v3, 1 }
 0x2f5   :  { %2070 = vrcp.f32 %v719_v41  ;;  %v710_v44 = vadd.f32 %v709_v43, %v708_v3  ;;  %v1980_v41 = vld [vmem:[#allocation7 + $0x24] ss:$16 sps:$4 sm:$0xff]   ;;  %v1983_v43 = vld [vmem:[#allocation7 + $0x2c] ss:$16 sps:$4 sm:$0xff]  }
 0x2f7   :  { %2072 = vrcp.f32 %v710_v44  ;;  %v1978_v44 = vld [vmem:[#allocation7 + $0x20] ss:$16 sps:$4 sm:$0xff]  }
 0x2ff   :  { %v2071_v45 = vpop.eup %2070 }
 0x300   :  { %v725_v46 = vmul.f32 %v2071_v45, %v2065_v22  ;;  %v724_v47 = vmul.f32 %v2071_v45, %v2063_v20  ;;  %v1981_v45 = vld [vmem:[#allocation7 + $0x28] ss:$16 sps:$4 sm:$0xff]  }
 0x301   :  { %v2073_v48 = vpop.eup %2072 }
 0x302   :  { %v722_v49 = vmul.f32 %v2073_v48, %v2067_v24  ;;  %v723_v50 = vmul.f32 %v2073_v48, %v2069_v27  ;;  %v727_v51 = vpack.c.bf16 %v725_v46, %v724_v47  ;;  %v1972_v27 = vld [vmem:[#allocation7] ss:$16 sps:$4 sm:$0xff]   ;;  %v1986_v46 = vld [vmem:[#allocation7 + $0x44] ss:$16 sps:$4 sm:$0xff]   ;;  %v1989_v47 = vld [vmem:[#allocation7 + $0x4c] ss:$16 sps:$4 sm:$0xff]  }
 0x303   :  { %v1984_v48 = vld [vmem:[#allocation7 + $0x40] ss:$16 sps:$4 sm:$0xff]  }
 0x304   :  { %v726_v10 = vpack.c.bf16 %v723_v50, %v722_v49  ;;  %v1987_v49 = vld [vmem:[#allocation7 + $0x48] ss:$16 sps:$4 sm:$0xff]   ;;  %v1992_v50 = vld [vmem:[#allocation7 + $0x64] ss:$16 sps:$4 sm:$0xff]  }
 0x306   :  { %1884 = vmatprep.mubr.msk.bf16.mxu0 %vm671_vm3, %v726_v10  ;;  %v1990_v10 = vld [vmem:[#allocation7 + $0x60] ss:$16 sps:$4 sm:$0xff]  }
 0x307   :  { %1885 = vmatmul.mubr.msk.bf16.vlgmr.msra.gmra.mrb[8].mxu0 %vm671_vm3, %v727_v51  ;;  %v1995_v51 = vld [vmem:[#allocation7 + $0x6c] ss:$16 sps:$4 sm:$0xff]  }
 0x308   :  { %1207 = vmatprep.mubr.bf16.mxu0 %v2215_v39  ;;  %1176 = vmatpush1.bf16.msra.mxu0 %v1972_v27  ;;  %v2023_v27 = vld [vmem:[#allocation8 + $0x80] sm:$0xff]  }
 0x309   :  { %1177 = vmatprep.subr.bf16.mxu0 %v1980_v41  ;;  %v2036_v41 = vld [vmem:[#allocation8 + $0x60] sm:$0xff]  }
 0x30c   :  { %1178 = vmatpush1.bf16.msra.mxu0 %v1978_v44  ;;  %v2038_v44 = vld [vmem:[#allocation8 + $0x20] sm:$0xff]  }
 0x30d   :  { %1179 = vmatprep.subr.bf16.mxu0 %v1986_v46  ;;  %v2040_v46 = vld [vmem:[#allocation8 + $0x68] sm:$0xff]  }
 0x310   :  { %1180 = vmatpush1.bf16.msra.mxu0 %v1984_v48  ;;  %v2042_v48 = vld [vmem:[#allocation8 + $0x28] sm:$0xff]  }
 0x311   :  { %1181 = vmatprep.subr.bf16.mxu0 %v1992_v50  ;;  %v2044_v50 = vld [vmem:[#allocation8 + $0x70] sm:$0xff]  }
 0x314   :  { %1182 = vmatpush1.bf16.msra.mxu0 %v1990_v10  ;;  %v2046_v10 = vld [vmem:[#allocation8 + $0x30] sm:$0xff]  }
 0x315   :  { %1183 = vmatprep.subr.bf16.mxu0 %v1998_v11  ;;  %v2049_v11 = vld [vmem:[#allocation8 + $0xf8] sm:$0xff]  }
 0x318   :  { %1184 = vmatpush1.bf16.msra.mxu0 %v1996_v52  ;;  %v2048_v52 = vld [vmem:[#allocation8 + $0x78] sm:$0xff]  }
 0x319   :  { %1185 = vmatprep.subr.bf16.mxu0 %v2004_v55  ;;  %v1005_v55 = vsub.s32 2, %v2497_v61 }
 0x3da   :  { %v1886_v57 = vpop.f32.mrb[8].mxu0 }
 0x3db   :  { %v790_v58 = vmul.f32 %v1886_v57, %v2519_v36  ;;  %v773_v59 = vpop.f32.mrb[9].mxu0  ;;  %v2002_v57 = vld [vmem:[#allocation7 + $0xa0] ss:$16 sps:$4 sm:$0xff]  }
 0x3dc   :  { %v788_v60 = vmul.f32 %v773_v59, %v2513_v21  ;;  %v1887_v62 = vpop.f32.mrb[10].mxu0  ;;  %v2010_v59 = vld [vmem:[#allocation7 + $0xc4] ss:$16 sps:$4 sm:$0xff]   ;;  %1186 = vmatpush1.bf16.msra.mxu0 %v2002_v57  ;;  %v1009_v57 = vsub.s32 3, %v2497_v61 }
 0x3dd   :  { %v791_v63 = vmul.f32 %v1887_v62, %v2521_v42  ;;  %v776_v2 = vpop.f32.mrb[11].mxu0  ;;  %v2008_v62 = vld [vmem:[#allocation7 + $0xc0] ss:$16 sps:$4 sm:$0xff]   ;;  %1187 = vmatprep.subr.bf16.mxu0 %v2010_v59 }
 0x3de   :  { %v789_v4 = vmul.f32 %v776_v2, %v2515_v26  ;;  %v2016_v2 = vld [vmem:[#allocation7 + $0xe4] ss:$16 sps:$4 sm:$0xff]  }
 0x3df   :  { %v799_v6 = vadd.f32 %v791_v63, %v790_v58  ;;  %v2005_v58 = vld [vmem:[#allocation7 + $0xa8] ss:$16 sps:$4 sm:$0xff]  }
 0x3e0   :  { %v792_v7 = vadd.f32 %v789_v4, %v788_v60  ;;  %v2013_v60 = vld [vmem:[#allocation7 + $0xcc] ss:$16 sps:$4 sm:$0xff]   ;;  %v2011_v63 = vld [vmem:[#allocation7 + $0xc8] ss:$16 sps:$4 sm:$0xff]   ;;  %1188 = vmatpush1.bf16.msra.mxu0 %v2008_v62 }
 0x3e1   :  { %v800_v8 = vrot.slane %v799_v6, 4  ;;  %v2019_v4 = vld [vmem:[#allocation7 + $0xec] ss:$16 sps:$4 sm:$0xff]   ;;  %1189 = vmatprep.subr.bf16.mxu0 %v2016_v2 }
 0x3e2   :  { %v793_v12 = vrot.slane %v792_v7, 4 }
 0x3e3   :  { %v801_v13 = vadd.f32 %v800_v8, %v799_v6  ;;  %v2014_v6 = vld [vmem:[#allocation7 + $0xe0] ss:$16 sps:$4 sm:$0xff]  }
 0x3e4   :  { %v794_v15 = vadd.f32 %v793_v12, %v792_v7  ;;  %v2017_v7 = vld [vmem:[#allocation7 + $0xe8] ss:$16 sps:$4 sm:$0xff]   ;;  %1190 = vmatpush1.bf16.msra.mxu0 %v2014_v6  ;;  %v2020_v8 = vld [vmem:[#allocation8 + $0x40] sm:$0xff]  }
 0x3e5   :  { %v802_v14 = vrot.slane %v801_v13, 2  ;;  %v2021_v12 = vld [vmem:[#allocation8 + $0xc0] sm:$0xff]   ;;  %1798 = vmatprep.subr.bf16.mxu0 %v2020_v8 }
 0x3e6   :  { %v795_v16 = vrot.slane %v794_v15, 2 }
 0x3e7   :  { %v803_v17 = vadd.f32 %v802_v14, %v801_v13 }
 0x3e8   :  { %v796_v18 = vadd.f32 %v795_v16, %v794_v15 }
 0x3e9   :  { %v804_v36 = vrot.slane %v803_v17, 1 }
 0x3ea   :  { %v797_v19 = vrot.slane %v796_v18, 1 }
 0x3eb   :  { %v805_v20 = vadd.f32 %v804_v36, %v803_v17 }
 0x3ec   :  { %v798_v21 = vadd.f32 %v797_v19, %v796_v18 }
 0x3ed   :  { %v807_v22 = vpack.c.bf16 %v805_v20, %v805_v20 }
 0x3ee   :  { %v806_v23 = vpack.c.bf16 %v798_v21, %v798_v21 }
 0x3ef   :  { %v834_v42 = vunpack.c.l.b16 %v807_v22  ;;  %v1691_v22 = vld [vmem:[%s2607_s14] ss:$0 sm:$0xff] }
 0x3f0   :  { %v833_v24 = vunpack.c.l.b16 %v806_v23 }
 0x3f2   :  { %v836_v26 = vsel %vm835_vm4, %v834_v42, %v833_v24  ;;  %v1692_v42 = vld [vmem:[%s2608_s15] ss:$0 sm:$0xff] }
 0x3f3   :  { %v837_v25 = vpack.c.b16 %v836_v26, %v836_v26 }
 0x3f5   :  { %1905 = vmatmul.mubr.bf16.vlgmr.msra.gmra.mrb[8].mxu1 %v837_v25  ;;  %v2022_v25 = vld [vmem:[#allocation8] sm:$0xff]  }
 0x3f6   :  { %1248 = vmatprep.mubr.bf16.mxu1 %v2215_v39  ;;  %1217 = vmatpush1.bf16.msra.mxu1 %v1975_v29  ;;  %v2084_v39 = vld [vmem:[%s2624_s12] sm:$0x3]  ;;  %v2024_v29 = vld [vmem:[#allocation8 + $0x48] sm:$0xff]  }
 0x3f7   :  { %1218 = vmatprep.subr.bf16.mxu1 %v1983_v43  ;;  %v2037_v43 = vld [vmem:[#allocation8 + $0xe0] sm:$0xff]  }
 0x3fa   :  { %1219 = vmatpush1.bf16.msra.mxu1 %v1981_v45  ;;  %v2039_v45 = vld [vmem:[#allocation8 + $0xa0] sm:$0xff]  }
 0x3fb   :  { %1220 = vmatprep.subr.bf16.mxu1 %v1989_v47  ;;  %v2041_v47 = vld [vmem:[#allocation8 + $0xe8] sm:$0xff]  }
 0x3fe   :  { %1221 = vmatpush1.bf16.msra.mxu1 %v1987_v49  ;;  %v2043_v49 = vld [vmem:[#allocation8 + $0xa8] sm:$0xff]  }
 0x3ff   :  { %1222 = vmatprep.subr.bf16.mxu1 %v1995_v51  ;;  %v2045_v51 = vld [vmem:[#allocation8 + $0xf0] sm:$0xff]  }
 0x402   :  { %1223 = vmatpush1.bf16.msra.mxu1 %v1993_v40  ;;  %v2047_v40 = vld [vmem:[#allocation8 + $0xb0] sm:$0xff]  }
 0x403   :  { %1224 = vmatprep.subr.bf16.mxu1 %v2001_v54  ;;  %v2051_v54 = vld [vmem:[#allocation8 + $0xb8] sm:$0xff]  }
 0x406   :  { %1225 = vmatpush1.bf16.msra.mxu1 %v1999_v53  ;;  %v2050_v53 = vld [vmem:[#allocation8 + $0x38] sm:$0xff]  }
 0x407   :  { %1226 = vmatprep.subr.bf16.mxu1 %v2007_v56  ;;  %v993_v56 = vld [vmem:[%s2610_s17] sm:$0xf] }
 0x408   :  { %v1006_v59 = vrot.slane %v993_v56, %v1005_v55  ;;  %v1010_v62 = vrot.slane %v993_v56, %v1009_v57 }
 0x40a   :  { %1227 = vmatpush1.bf16.msra.mxu1 %v2005_v58  ;;  %v998_v58 = vrot.slane %v993_v56, %v2508_v9 }
 0x40b   :  { %1228 = vmatprep.subr.bf16.mxu1 %v2013_v60  ;;  %v1002_v60 = vrot.slane %v993_v56, %v381_v1 }
 0x40e   :  { %1229 = vmatpush1.bf16.msra.mxu1 %v2011_v63 }
 0x40f   :  { %1230 = vmatprep.subr.bf16.mxu1 %v2019_v4 }
 0x412   :  { %1231 = vmatpush1.bf16.msra.mxu1 %v2017_v7 }
 0x413   :  { %1820 = vmatprep.subr.bf16.mxu1 %v2021_v12 }
 0x4c8   :  { %v921_v31 = vpop.f32.mrb[8].mxu1 }
 0x4c9   :  { %v922_v32 = vadd.f32 %v1682_v0, %v921_v31  ;;  %v1906_v33 = vpop.f32.mrb[9].mxu1  ;;  %v2026_v0 = vld [vmem:[#allocation8 + $0x8] sm:$0xff]  }
 0x4ca   :  { %v924_v34 = vpop.f32.mrb[10].mxu1  ;;  %v2027_v31 = vld [vmem:[#allocation8 + $0x88] sm:$0xff]   ;;  %v2029_v33 = vld [vmem:[#allocation8 + $0xd0] sm:$0xff]  }
 0x4cb   :  { %v2555_v5 = vadd.f32 %v2084_v39, %v922_v32  ;;  %v1907_v35 = vpop.f32.mrb[11].mxu1  ;;  %v2028_v32 = vld [vmem:[#allocation8 + $0x50] sm:$0xff]  }
 0x4cc   :  { %v2030_v34 = vld [vmem:[#allocation8 + $0x10] sm:$0xff]   ;;  %v2032_v35 = vld [vmem:[#allocation8 + $0x58] sm:$0xff]  }
 0x4cd   :  { %v930_v37 = vsel %vm133_vm0, %v2555_v5, 0.0  ;;  %v934_v38 = vmul.f32 %v2555_v5, %v2555_v5  ;;  %v2031_v39 = vld [vmem:[#allocation8 + $0x90] sm:$0xff]  }
 0x4ce   :  { %931 = vadd.xlane.f32.xlu0 %v930_v37  ;;  %v2033_v37 = vld [vmem:[#allocation8 + $0xd8] sm:$0xff]  }
 0x4cf   :  { %v935_v3 = vsel %vm133_vm0, %v934_v38, 0.0  ;;  %v2034_v38 = vld [vmem:[#allocation8 + $0x18] sm:$0xff]  }
 0x4d0   :  { %936 = vadd.xlane.f32.xlu1 %v935_v3  ;;  %v2035_v3 = vld [vmem:[#allocation8 + $0x98] sm:$0xff]  }
 0x55b   :  { %v932_v13 = vpop.xlane.xlu0 %931 }
 0x55c   :  { %v933_v15 = vmul.f32 0.0078125, %v932_v13 }
 0x55d   :  { %v937_v14 = vpop.xlane.xlu1 %936 }
 0x55e   :  { %v939_v16 = vmul.f32 %v933_v15, %v933_v15  ;;  %v938_v17 = vmul.f32 0.0078125, %v937_v14  ;;  %v942_v20 = vsub.f32 %v2555_v5, %v933_v15 }
 0x560   :  { %v940_v18 = vsub.f32 %v938_v17, %v939_v16 }
 0x562   :  { %v941_v36 = vmax.f32 %v940_v18, 0.0 }
 0x564   :  { %v943_v19 = vadd.f32 1e-05, %v941_v36 }
 0x566   :  { %2074 = vrsqrt.f32 %v943_v19 }
 0x570   :  { %v2075_v21 = vpop.eup %2074 }
 0x571   :  { %v945_v23 = vmul.f32 %v2075_v21, %v942_v20 }
 0x573   :  { %v952_v24 = vmul.f32 %v1691_v22, %v945_v23 }
 0x575   :  { %v959_v26 = vadd.f32 %v1692_v42, %v952_v24 }
 0x577   :  { %v960_v28 = vpack.c.bf16 %v959_v26, %v959_v26 }
 0x579   :  { %1208 = vmatmul.mubr.bf16.vlgmr.msra.gmra.mrb[12].mxu0 %v960_v28  ;;  %1249 = vmatmul.mubr.bf16.vlgmr.msra.gmra.mrb[12].mxu1 %v960_v28 }
 0x57a   :  { %1799 = vmatpush3.bf16.msra.mxu0 %v2022_v25  ;;  %1821 = vmatpush3.bf16.msra.mxu1 %v2023_v27 }
 0x57b   :  { %1800 = vmatprep.subr.bf16.mxu0 %v2024_v29  ;;  %1822 = vmatprep.subr.bf16.mxu1 %v2025_v30 }
 0x57e   :  { %1801 = vmatpush3.bf16.msra.mxu0 %v2026_v0  ;;  %1823 = vmatpush3.bf16.msra.mxu1 %v2027_v31 }
 0x57f   :  { %1802 = vmatprep.subr.bf16.mxu0 %v2028_v32  ;;  %1824 = vmatprep.subr.bf16.mxu1 %v2029_v33 }
 0x582   :  { %1803 = vmatpush3.bf16.msra.mxu0 %v2030_v34  ;;  %1825 = vmatpush3.bf16.msra.mxu1 %v2031_v39 }
 0x583   :  { %1804 = vmatprep.subr.bf16.mxu0 %v2032_v35  ;;  %1826 = vmatprep.subr.bf16.mxu1 %v2033_v37 }
 0x586   :  { %1805 = vmatpush3.bf16.msra.mxu0 %v2034_v38  ;;  %1827 = vmatpush3.bf16.msra.mxu1 %v2035_v3  ;;  %v1725_v38 = vld [vmem:[%s2612_s19] ss:$0 sm:$0xff] }
 0x587   :  { %1806 = vmatprep.subr.bf16.mxu0 %v2036_v41  ;;  %1828 = vmatprep.subr.bf16.mxu1 %v2037_v43 }
 0x58a   :  { %1807 = vmatpush3.bf16.msra.mxu0 %v2038_v44  ;;  %1829 = vmatpush3.bf16.msra.mxu1 %v2039_v45 }
 0x58b   :  { %1808 = vmatprep.subr.bf16.mxu0 %v2040_v46  ;;  %1830 = vmatprep.subr.bf16.mxu1 %v2041_v47 }
 0x58e   :  { %1809 = vmatpush3.bf16.msra.mxu0 %v2042_v48  ;;  %1831 = vmatpush3.bf16.msra.mxu1 %v2043_v49 }
 0x58f   :  { %1810 = vmatprep.subr.bf16.mxu0 %v2044_v50  ;;  %1832 = vmatprep.subr.bf16.mxu1 %v2045_v51 }
 0x592   :  { %1811 = vmatpush3.bf16.msra.mxu0 %v2046_v10  ;;  %1833 = vmatpush3.bf16.msra.mxu1 %v2047_v40 }
 0x593   :  { %1812 = vmatprep.subr.bf16.mxu0 %v2048_v52  ;;  %1834 = vmatprep.subr.bf16.mxu1 %v2049_v11 }
 0x596   :  { %1813 = vmatpush3.bf16.msra.mxu0 %v2050_v53  ;;  %1835 = vmatpush3.bf16.msra.mxu1 %v2051_v54 }
 0x64c   :  { %v1209_v63 = vpop.f32.mrb[12].mxu0  ;;  %v1250_v2 = vpop.f32.mrb[12].mxu1 }
 0x64d   :  { %v1210_v4 = vadd.f32 %v1209_v63, %v998_v58  ;;  %v1251_v6 = vadd.f32 %v1250_v2, %v1006_v59  ;;  %v1211_v7 = vpop.f32.mrb[13].mxu0  ;;  %v1252_v8 = vpop.f32.mrb[13].mxu1 }
 0x64e   :  { %v1212_v12 = vadd.f32 %v1211_v7, %v1002_v60  ;;  %v1253_v13 = vadd.f32 %v1252_v8, %v1010_v62  ;;  %v1213_v15 = vpop.f32.mrb[14].mxu0  ;;  %v1254_v14 = vpop.f32.mrb[14].mxu1 }
 0x64f   :  { %v1261_v16 = vmul.f32 0.70710677, %v1210_v4  ;;  %v1263_v17 = vmul.f32 0.70710677, %v1251_v6  ;;  %v1214_v9 = vpop.f32.mrb[15].mxu0  ;;  %v1255_v19 = vpop.f32.mrb[15].mxu1 }
 0x650   :  { %v1262_v18 = vmul.f32 0.70710677, %v1212_v12  ;;  %v1264_v36 = vmul.f32 0.70710677, %v1253_v13  ;;  %v1257_v22 = vmul.f32 0.5, %v1210_v4  ;;  %v1259_v24 = vmul.f32 0.5, %v1251_v6 }
 0x651   :  { %2076 = verf.f32 %v1261_v16  ;;  %v1258_v26 = vmul.f32 0.5, %v1212_v12  ;;  %v1260_v28 = vmul.f32 0.5, %v1253_v13 }
 0x652   :  { %2078 = verf.f32 %v1263_v17 }
 0x653   :  { %2080 = verf.f32 %v1262_v18 }
 0x654   :  { %2082 = verf.f32 %v1264_v36 }
 0x65b   :  { %v2077_v61 = vpop.eup %2076 }
 0x65c   :  { %v2079_v1 = vpop.eup %2078  ;;  %v1269_v20 = vadd.f32 1.0, %v2077_v61 }
 0x65d   :  { %v2081_v21 = vpop.eup %2080  ;;  %v1271_v23 = vadd.f32 1.0, %v2079_v1 }
 0x65e   :  { %v2083_v42 = vpop.eup %2082  ;;  %v1270_v25 = vadd.f32 1.0, %v2081_v21  ;;  %v1273_v27 = vmul.f32 %v1269_v20, %v1257_v22 }
 0x65f   :  { %v1272_v29 = vadd.f32 1.0, %v2083_v42  ;;  %v1275_v30 = vmul.f32 %v1271_v23, %v1259_v24 }
 0x660   :  { %v1274_v0 = vmul.f32 %v1270_v25, %v1258_v26  ;;  %v1277_v33 = vpack.c.bf16 %v1273_v27, %v1273_v27 }
 0x661   :  { %v1276_v31 = vmul.f32 %v1272_v29, %v1260_v28  ;;  %v1279_v39 = vpack.c.bf16 %v1275_v30, %v1275_v30 }
 0x662   :  { %v1278_v32 = vpack.c.bf16 %v1274_v0, %v1274_v0 }
 0x663   :  { %v1280_v34 = vpack.c.bf16 %v1276_v31, %v1276_v31 }
 0x664   :  { %1576 = vmatprep.mubr.bf16.mxu0 %v1278_v32 }
 0x665   :  { %1616 = vmatprep.mubr.bf16.mxu1 %v1280_v34  ;;  %1577 = vmatmul.mubr.bf16.vlgmr.msra.gmra.mrb[16].mxu0 %v1277_v33 }
 0x666   :  { %1617 = vmatmul.mubr.bf16.vlgmr.msra.gmra.mrb[16].mxu1 %v1279_v39 }
 0x738   :  { %v1814_v35 = vpop.f32.mrb[16].mxu0 }
 0x739   :  { %v1836_v37 = vpop.f32.mrb[16].mxu1  ;;  %v1815_v3 = vpop.f32.mrb[17].mxu0 }
 0x73a   :  { %v1816_v41 = vadd.f32 %v1815_v3, %v1814_v35  ;;  %v1837_v43 = vpop.f32.mrb[17].mxu1  ;;  %v1817_v44 = vpop.f32.mrb[18].mxu0 }
 0x73b   :  { %v1838_v45 = vadd.f32 %v1837_v43, %v1836_v37  ;;  %v1839_v46 = vpop.f32.mrb[18].mxu1  ;;  %v1818_v47 = vpop.f32.mrb[19].mxu0 }
 0x73c   :  { %v1579_v48 = vadd.f32 %v1816_v41, %v1725_v38  ;;  %v1840_v49 = vpop.f32.mrb[19].mxu1 }
 0x73e   :  { %v1619_v50 = vadd.f32 %v1838_v45, %v1579_v48 }
 0x740   :  { %v1624_v51 = vadd.f32 %v1619_v50, %v2555_v5 }
 0x742   :  { %1625 = vst [vmem:[#allocation10] sm:$0x3] %v1624_v51 }
 0x743   :  { %2184 = shalt.err (!%p2181_p8)
}
 0x744   :  { %s2185_s30 = scalar_lea.hbm %s2613_s20, 32 }
 0x745   :  { %p2186_p9 = scmp.ne.s32.totalorder %s2613_s20, %s2185_s30  ;;  %p2189_p10 = scmp.lt.u32.totalorder %s2185_s30, %s2613_s20 }
 0x747   :  { %p2191_p11 = pnand %p2189_p10, %p2186_p9 }
 0x749   :  { %2194 = shalt.err (!%p2191_p11)
}
 0x74a   :  { %1635 = dma.vmem_to_hbm [thread:$0]  %s1633_s10, 32, %s2613_s20, [#allocation4]  }
 0x74b   :  { %2201 = dma.done.wait [#allocation4], 32  }
 0x74c   :  { %2202 = vsyncadd [#allocation4], 4294967264 }
 0x74d   :  { %1639 = vsyncpa [#allocation3], 1 }
 0x74e   :  { %1640 = vsyncpa [#allocation6], 1 }
 0x74f   :  { %1641 = vsyncpa [#allocation9], 1 }
 0x750   :  { %1642 = vsyncpa [#allocation4], 1 }

</bundles_post_ra>
